<compile_context>
chip_gen: v7x
topology: tpu7x:2x2x1
jax: 0.10.0
libtpu: 0.0.40
codegen_flags: <defaults>
</compile_context>

<pallas_src>
import functools

import jax
import jax.numpy as jnp
import numpy as np
from jax import lax
from jax.experimental import pallas as pl
from jax.experimental.pallas import tpu as pltpu

_ROW_TILE_CAP = 256  # rows per grid step; sized for v7x 64 MiB VMEM w/ double buffering


def _round_up(x, m):
    return (x + m - 1) // m * m


def _row_tiling(m_rows):
    """Pick (padded_rows, tile_rows): tile divides padded rows, sublane aligned."""
    if m_rows <= _ROW_TILE_CAP:
        tm = _round_up(m_rows, 16)
        return tm, tm
    tm = _ROW_TILE_CAP
    return _round_up(m_rows, tm), tm


# ----------------------------- Pallas kernels ------------------------------


def _conv_relu_pool_kernel(x_ref, w_ref, b_ref, o_ref):
    # x_ref: (4, TM, 9*Cin) bf16 taps, leading axis = 2x2 pool position
    # w_ref: (9*Cin, Cout) bf16 (resident); b_ref: (1, Cout) f32
    # o_ref: (TM, Cout) pooled output
    four, tm, k = x_ref.shape
    cout = w_ref.shape[1]
    x2 = x_ref[...].reshape(four * tm, k)                       # leading-dim collapse (layout no-op)
    acc = jnp.dot(x2, w_ref[...], preferred_element_type=jnp.float32)
    acc = jnp.maximum(acc + b_ref[...], 0.0)                    # bias + ReLU in f32
    acc = acc.reshape(four, tm, cout)
    pooled = jnp.maximum(jnp.maximum(acc[0], acc[1]),
                         jnp.maximum(acc[2], acc[3]))           # 2x2 max-pool
    o_ref[...] = pooled.astype(o_ref.dtype)


def _convt_phase_kernel(x_ref, w_ref, b_ref, o_ref, *, activation):
    # x_ref: (TM, 4*Cin) bf16 (the 2x2 input neighborhood per output site)
    # w_ref: (4*Cin, 4*Cout) bf16, 4 phase columns (zero blocks where tap unused)
    # b_ref: (1, 4*Cout) f32; o_ref: (TM, 4*Cout)
    acc = jnp.dot(x_ref[...], w_ref[...], preferred_element_type=jnp.float32)
    acc = acc + b_ref[...]
    if activation == "relu":
        acc = jnp.maximum(acc, 0.0)
    elif activation == "sigmoid":
        acc = pl.reciprocal(1.0 + jnp.exp(-acc), approx=True)   # EUP exp + recip
    o_ref[...] = acc.astype(o_ref.dtype)


# ------------------------------- layer glue --------------------------------


def _conv_relu_pool(x_nhwc, w_oihw, b):
    """Conv2d(Cin,Cout,3,padding=1) + ReLU + MaxPool2d(2,2), fused in one kernel."""
    N, H, W, Cin = x_nhwc.shape
    assert H % 2 == 0 and W % 2 == 0
    Cout = w_oihw.shape[0]
    Ho, Wo = H // 2, W // 2
    Mp = N * Ho * Wo
    K = 9 * Cin

    xpad = jnp.pad(x_nhwc, ((0, 0), (1, 1), (1, 1), (0, 0)))
    taps = []
    for dy in range(3):
        for dx in range(3):
            t = xpad[:, dy:dy + H, dx:dx + W, :]                       # (N,H,W,Cin)
            t = t.reshape(N, Ho, 2, Wo, 2, Cin).transpose(2, 4, 0, 1, 3, 5)
            taps.append(t.reshape(4, Mp, Cin))
    taps = jnp.concatenate(taps, axis=-1).astype(jnp.bfloat16)         # (4, Mp, 9*Cin)

    w = jnp.transpose(w_oihw, (2, 3, 1, 0)).reshape(K, Cout).astype(jnp.bfloat16)
    b2 = b.reshape(1, Cout).astype(jnp.float32)

    Mp_pad, TM = _row_tiling(Mp)
    if Mp_pad != Mp:
        taps = jnp.pad(taps, ((0, 0), (0, Mp_pad - Mp), (0, 0)))

    out = pl.pallas_call(
        _conv_relu_pool_kernel,
        out_shape=jax.ShapeDtypeStruct((Mp_pad, Cout), jnp.bfloat16),
        grid_spec=pltpu.PrefetchScalarGridSpec(
            num_scalar_prefetch=0,
            grid=(Mp_pad // TM,),
            in_specs=[pl.BlockSpec((4, TM, K), lambda i: (0, i, 0)),
                      pl.BlockSpec((K, Cout), lambda i: (0, 0)),
                      pl.BlockSpec((1, Cout), lambda i: (0, 0))],
            out_specs=pl.BlockSpec((TM, Cout), lambda i: (i, 0))),
        compiler_params=pltpu.CompilerParams(dimension_semantics=("parallel",)),
    )(taps, w, b2)
    return out[:Mp].reshape(N, Ho, Wo, Cout)


def _conv_transpose_act(x_nhwc, w_iohw, b, activation, out_dtype):
    """ConvTranspose2d(Cin,Cout,3,stride=2,padding=1,output_padding=1) + activation,
    via the 4-phase sub-pixel decomposition (one GEMM, no zero-dilated input)."""
    N, H, W, Cin = x_nhwc.shape
    Cout = w_iohw.shape[1]
    Mp = N * H * W

    # 2x2 neighborhood taps A=x[i,j], B=x[i,j+1], C=x[i+1,j], D=x[i+1,j+1]
    x_ext = jnp.pad(x_nhwc, ((0, 0), (0, 1), (0, 1), (0, 0)))
    A = x_ext[:, :H, :W, :]
    B = x_ext[:, :H, 1:, :]
    C = x_ext[:, 1:, :W, :]
    D = x_ext[:, 1:, 1:, :]
    taps = jnp.concatenate([A, B, C, D], axis=-1).reshape(Mp, 4 * Cin).astype(jnp.bfloat16)

    # Flipped HWIO weights of the equivalent forward conv.
    wf = jnp.transpose(w_iohw, (2, 3, 0, 1))[::-1, ::-1, :, :]         # (3,3,Cin,Cout)
    Z = jnp.zeros((Cin, Cout), wf.dtype)
    cols = [
        jnp.concatenate([wf[1, 1], Z,        Z,        Z       ], axis=0),  # phase (even,even)
        jnp.concatenate([wf[1, 0], wf[1, 2], Z,        Z       ], axis=0),  # phase (even,odd)
        jnp.concatenate([wf[0, 1], Z,        wf[2, 1], Z       ], axis=0),  # phase (odd,even)
        jnp.concatenate([wf[0, 0], wf[0, 2], wf[2, 0], wf[2, 2]], axis=0),  # phase (odd,odd)
    ]
    w_big = jnp.concatenate(cols, axis=1).astype(jnp.bfloat16)         # (4*Cin, 4*Cout)
    b_big = jnp.tile(b.reshape(1, Cout).astype(jnp.float32), (1, 4))   # (1, 4*Cout)

    Mp_pad, TM = _row_tiling(Mp)
    if Mp_pad != Mp:
        taps = jnp.pad(taps, ((0, Mp_pad - Mp), (0, 0)))

    out = pl.pallas_call(
        functools.partial(_convt_phase_kernel, activation=activation),
        out_shape=jax.ShapeDtypeStruct((Mp_pad, 4 * Cout), out_dtype),
        grid_spec=pltpu.PrefetchScalarGridSpec(
            num_scalar_prefetch=0,
            grid=(Mp_pad // TM,),
            in_specs=[pl.BlockSpec((TM, 4 * Cin), lambda i: (i, 0)),
                      pl.BlockSpec((4 * Cin, 4 * Cout), lambda i: (0, 0)),
                      pl.BlockSpec((1, 4 * Cout), lambda i: (0, 0))],
            out_specs=pl.BlockSpec((TM, 4 * Cout), lambda i: (i, 0))),
        compiler_params=pltpu.CompilerParams(dimension_semantics=("parallel",)),
    )(taps, w_big, b_big)

    out = out[:Mp].reshape(N, H, W, 2, 2, Cout)                        # (.., py, px, Cout)
    return out.transpose(0, 1, 3, 2, 4, 5).reshape(N, 2 * H, 2 * W, Cout)


# ------------------------------ model forward ------------------------------


def init_params(key):
    ks = jax.random.split(key, 12)
    n = lambda k, s, scale: scale * jax.random.normal(k, s, jnp.float32)
    return {
        # encoder Conv2d weights OIHW, biases (Cout,)
        "e1_w": n(ks[0], (32, 3, 3, 3), 0.1),   "e1_b": n(ks[1], (32,), 0.01),
        "e2_w": n(ks[2], (64, 32, 3, 3), 0.1),  "e2_b": n(ks[3], (64,), 0.01),
        "e3_w": n(ks[4], (128, 64, 3, 3), 0.1), "e3_b": n(ks[5], (128,), 0.01),
        # decoder ConvTranspose2d weights (Cin, Cout, kH, kW)
        "d1_w": n(ks[6], (128, 64, 3, 3), 0.1), "d1_b": n(ks[7], (64,), 0.01),
        "d2_w": n(ks[8], (64, 32, 3, 3), 0.1),  "d2_b": n(ks[9], (32,), 0.01),
        "d3_w": n(ks[10], (32, 1, 3, 3), 0.1),  "d3_b": n(ks[11], (1,), 0.01),
    }


def autoencoder_forward(params, x_nchw):
    # Dropout layers act as identity (eval-mode semantics).
    x = jnp.transpose(x_nchw, (0, 2, 3, 1)).astype(jnp.float32)        # NCHW -> NHWC
    # encoder: fused conv+ReLU+pool, bf16 activations between layers
    x = _conv_relu_pool(x, params["e1_w"], params["e1_b"])
    x = _conv_relu_pool(x, params["e2_w"], params["e2_b"])
    x = _conv_relu_pool(x, params["e3_w"], params["e3_b"])
    # decoder: 4-phase transposed conv + activation
    x = _conv_transpose_act(x, params["d1_w"], params["d1_b"], "relu", jnp.bfloat16)
    x = _conv_transpose_act(x, params["d2_w"], params["d2_b"], "relu", jnp.bfloat16)
    x = _conv_transpose_act(x, params["d3_w"], params["d3_b"], "sigmoid", jnp.float32)
    return jnp.transpose(x, (0, 3, 1, 2))                               # NHWC -> NCHW


# --------------------------- pure-JAX references ----------------------------


def _ref_forward_f32(params, x_nchw):
    dn = ("NHWC", "HWIO", "NHWC")
    x = jnp.transpose(x_nchw, (0, 2, 3, 1)).astype(jnp.float32)

    def conv(x, w_oihw, b):
        w = jnp.transpose(w_oihw, (2, 3, 1, 0))
        return lax.conv_general_dilated(x, w, (1, 1), "SAME", dimension_numbers=dn) + b

    def convt(x, w_iohw, b):
        w = jnp.transpose(w_iohw, (2, 3, 0, 1))[::-1, ::-1, :, :]
        return lax.conv_general_dilated(x, w, (1, 1), ((1, 2), (1, 2)),
                                        lhs_dilation=(2, 2), dimension_numbers=dn) + b

    def pool(x):
        return lax.reduce_window(x, -jnp.inf, lax.max, (1, 2, 2, 1), (1, 2, 2, 1), "VALID")

    x = pool(jax.nn.relu(conv(x, params["e1_w"], params["e1_b"])))
    x = pool(jax.nn.relu(conv(x, params["e2_w"], params["e2_b"])))
    x = pool(jax.nn.relu(conv(x, params["e3_w"], params["e3_b"])))
    x = jax.nn.relu(convt(x, params["d1_w"], params["d1_b"]))
    x = jax.nn.relu(convt(x, params["d2_w"], params["d2_b"]))
    x = jax.nn.sigmoid(convt(x, params["d3_w"], params["d3_b"]))
    return jnp.transpose(x, (0, 3, 1, 2))


def _ref_forward_bf16(params, x_nchw):
    """Mirrors the Pallas path's bf16 operand casts with f32 accumulation."""
    dn = ("NHWC", "HWIO", "NHWC")
    bf16, f32 = jnp.bfloat16, jnp.float32
    x = jnp.transpose(x_nchw, (0, 2, 3, 1)).astype(f32)

    def conv(x, w_oihw, b):
        w = jnp.transpose(w_oihw, (2, 3, 1, 0)).astype(bf16)
        y = lax.conv_general_dilated(x.astype(bf16), w, (1, 1), "SAME",
                                     dimension_numbers=dn, preferred_element_type=f32)
        return y + b.astype(f32)

    def convt(x, w_iohw, b):
        w = jnp.transpose(w_iohw, (2, 3, 0, 1))[::-1, ::-1, :, :].astype(bf16)
        y = lax.conv_general_dilated(x.astype(bf16), w, (1, 1), ((1, 2), (1, 2)),
                                     lhs_dilation=(2, 2), dimension_numbers=dn,
                                     preferred_element_type=f32)
        return y + b.astype(f32)

    def pool(x):
        return lax.reduce_window(x, -jnp.inf, lax.max, (1, 2, 2, 1), (1, 2, 2, 1), "VALID")

    x = pool(jax.nn.relu(conv(x, params["e1_w"], params["e1_b"]))).astype(bf16)
    x = pool(jax.nn.relu(conv(x, params["e2_w"], params["e2_b"]))).astype(bf16)
    x = pool(jax.nn.relu(conv(x, params["e3_w"], params["e3_b"]))).astype(bf16)
    x = jax.nn.relu(convt(x, params["d1_w"], params["d1_b"])).astype(bf16)
    x = jax.nn.relu(convt(x, params["d2_w"], params["d2_b"])).astype(bf16)
    x = jax.nn.sigmoid(convt(x, params["d3_w"], params["d3_b"]))
    return jnp.transpose(x, (0, 3, 1, 2))


if __name__ == "__main__":
    key = jax.random.PRNGKey(0)
    pkey, xkey = jax.random.split(key)
    params = init_params(pkey)
    x = jax.random.normal(xkey, (2, 3, 16, 16), jnp.float32)  # NCHW, like the PyTorch module

    out = jax.jit(autoencoder_forward)(params, x)
    out = jax.block_until_ready(out)
    assert out.shape == (2, 1, 16, 16), out.shape

    # Tight check against a reference that uses the same bf16-operand / f32-accum math.
    ref_bf16 = _ref_forward_bf16(params, x)
    np.testing.assert_allclose(np.asarray(out), np.asarray(ref_bf16), rtol=5e-3, atol=5e-3)

    # Loose sanity check against the full-f32 reference (bf16 quantization noise only).
    ref_f32 = _ref_forward_f32(params, x)
    np.testing.assert_allclose(np.asarray(out), np.asarray(ref_f32), rtol=5e-2, atol=5e-2)

    print("KERNEL_OK")
</pallas_src>

<mosaic_0001>
module attributes {stable_mosaic.version = 11 : i64} {
  func.func @_conv_relu_pool_kernel(%arg0: i32, %arg1: memref<4x128x27xbf16, #tpu.memory_space<vmem>>, %arg2: memref<27x32xbf16, #tpu.memory_space<vmem>>, %arg3: memref<1x32xf32, #tpu.memory_space<vmem>>, %arg4: memref<128x32xbf16, #tpu.memory_space<vmem>>) attributes {dimension_semantics = [#tpu.dimension_semantics<parallel>], iteration_bounds = array<i64: 1>, scalar_prefetch = 0 : i64, scratch_operands = 0 : i64, tpu.core_type = #tpu.core_type<tc>, window_params = [{transform_indices = @transform_0, window_bounds = array<i64: 4, 128, 27>}, {pipeline_mode = #tpu.pipeline_mode<synchronous>, transform_indices = @transform_1, window_bounds = array<i64: 27, 32>}, {pipeline_mode = #tpu.pipeline_mode<synchronous>, transform_indices = @transform_2, window_bounds = array<i64: 1, 32>}, {transform_indices = @transform_3, window_bounds = array<i64: 128, 32>}]} {
    %c0 = arith.constant 0 : index
    %c0_0 = arith.constant 0 : index
    %c0_1 = arith.constant 0 : index
    %0 = vector.load %arg1[%c0, %c0_0, %c0_1] : memref<4x128x27xbf16, #tpu.memory_space<vmem>>, vector<4x128x27xbf16>
    %1 = vector.shape_cast %0 : vector<4x128x27xbf16> to vector<512x27xbf16>
    %c0_2 = arith.constant 0 : index
    %c0_3 = arith.constant 0 : index
    %2 = vector.load %arg2[%c0_2, %c0_3] : memref<27x32xbf16, #tpu.memory_space<vmem>>, vector<27x32xbf16>
    %cst = arith.constant dense<0.000000e+00> : vector<512x32xf32>
    %3 = tpu.matmul %1, %2, %cst {dimension_numbers = #tpu.dot_dimension_numbers<[1], [0], [0], [1], [0, 0, 1, 1], [], []>} : vector<512x27xbf16>, vector<27x32xbf16>, vector<512x32xf32> -> vector<512x32xf32>
    %c0_4 = arith.constant 0 : index
    %c0_5 = arith.constant 0 : index
    %4 = vector.load %arg3[%c0_4, %c0_5] : memref<1x32xf32, #tpu.memory_space<vmem>>, vector<1x32xf32>
    %5 = vector.broadcast %4 : vector<1x32xf32> to vector<512x32xf32>
    %6 = arith.addf %3, %5 : vector<512x32xf32>
    %cst_6 = arith.constant 0.000000e+00 : f32
    %7 = vector.broadcast %cst_6 : f32 to vector<512x32xf32>
    %8 = arith.maximumf %6, %7 : vector<512x32xf32>
    %9 = vector.shape_cast %8 : vector<512x32xf32> to vector<4x128x32xf32>
    %10 = vector.extract_strided_slice %9 {offsets = [0, 0, 0], sizes = [1, 128, 32], strides = [1, 1, 1]} : vector<4x128x32xf32> to vector<1x128x32xf32>
    %11 = vector.shape_cast %10 : vector<1x128x32xf32> to vector<128x32xf32>
    %12 = vector.extract_strided_slice %9 {offsets = [1, 0, 0], sizes = [1, 128, 32], strides = [1, 1, 1]} : vector<4x128x32xf32> to vector<1x128x32xf32>
    %13 = vector.shape_cast %12 : vector<1x128x32xf32> to vector<128x32xf32>
    %14 = arith.maximumf %11, %13 : vector<128x32xf32>
    %15 = vector.extract_strided_slice %9 {offsets = [2, 0, 0], sizes = [1, 128, 32], strides = [1, 1, 1]} : vector<4x128x32xf32> to vector<1x128x32xf32>
    %16 = vector.shape_cast %15 : vector<1x128x32xf32> to vector<128x32xf32>
    %17 = vector.extract_strided_slice %9 {offsets = [3, 0, 0], sizes = [1, 128, 32], strides = [1, 1, 1]} : vector<4x128x32xf32> to vector<1x128x32xf32>
    %18 = vector.shape_cast %17 : vector<1x128x32xf32> to vector<128x32xf32>
    %19 = arith.maximumf %16, %18 : vector<128x32xf32>
    %20 = arith.maximumf %14, %19 : vector<128x32xf32>
    %21 = arith.truncf %20 : vector<128x32xf32> to vector<128x32xbf16>
    %c0_7 = arith.constant 0 : index
    %c0_8 = arith.constant 0 : index
    %22 = vector.load %arg4[%c0_7, %c0_8] : memref<128x32xbf16, #tpu.memory_space<vmem>>, vector<128x32xbf16>
    tpu.vector_store %arg4[%c0_7, %c0_8], %21 {strides = array<i32>} : memref<128x32xbf16, #tpu.memory_space<vmem>>, vector<128x32xbf16>,
    return
  }
  func.func @transform_0(%arg0: i32) -> (i32, i32, i32) {
    %c0_i32 = arith.constant 0 : i32
    %c0_i32_0 = arith.constant 0 : i32
    %c0_i32_1 = arith.constant 0 : i32
    return %c0_i32, %arg0, %c0_i32_0 : i32, i32, i32
  }
  func.func @transform_1(%arg0: i32) -> (i32, i32) {
    %c0_i32 = arith.constant 0 : i32
    %c0_i32_0 = arith.constant 0 : i32
    %c0_i32_1 = arith.constant 0 : i32
    return %c0_i32, %c0_i32_0 : i32, i32
  }
  func.func @transform_2(%arg0: i32) -> (i32, i32) {
    %c0_i32 = arith.constant 0 : i32
    %c0_i32_0 = arith.constant 0 : i32
    %c0_i32_1 = arith.constant 0 : i32
    return %c0_i32, %c0_i32_0 : i32, i32
  }
  func.func @transform_3(%arg0: i32) -> (i32, i32) {
    %c0_i32 = arith.constant 0 : i32
    %c0_i32_0 = arith.constant 0 : i32
    return %arg0, %c0_i32 : i32, i32
  }
}

module attributes {stable_mosaic.version = 11 : i64} {
  func.func @_conv_relu_pool_kernel(%arg0: i32, %arg1: memref<4x32x288xbf16, #tpu.memory_space<vmem>>, %arg2: memref<288x64xbf16, #tpu.memory_space<vmem>>, %arg3: memref<1x64xf32, #tpu.memory_space<vmem>>, %arg4: memref<32x64xbf16, #tpu.memory_space<vmem>>) attributes {dimension_semantics = [#tpu.dimension_semantics<parallel>], iteration_bounds = array<i64: 1>, scalar_prefetch = 0 : i64, scratch_operands = 0 : i64, tpu.core_type = #tpu.core_type<tc>, window_params = [{transform_indices = @transform_0, window_bounds = array<i64: 4, 32, 288>}, {pipeline_mode = #tpu.pipeline_mode<synchronous>, transform_indices = @transform_1, window_bounds = array<i64: 288, 64>}, {pipeline_mode = #tpu.pipeline_mode<synchronous>, transform_indices = @transform_2, window_bounds = array<i64: 1, 64>}, {transform_indices = @transform_3, window_bounds = array<i64: 32, 64>}]} {
    %c0 = arith.constant 0 : index
    %c0_0 = arith.constant 0 : index
    %c0_1 = arith.constant 0 : index
    %0 = vector.load %arg1[%c0, %c0_0, %c0_1] : memref<4x32x288xbf16, #tpu.memory_space<vmem>>, vector<4x32x288xbf16>
    %1 = vector.shape_cast %0 : vector<4x32x288xbf16> to vector<128x288xbf16>
    %c0_2 = arith.constant 0 : index
    %c0_3 = arith.constant 0 : index
    %2 = vector.load %arg2[%c0_2, %c0_3] : memref<288x64xbf16, #tpu.memory_space<vmem>>, vector<288x64xbf16>
    %cst = arith.constant dense<0.000000e+00> : vector<128x64xf32>
    %3 = tpu.matmul %1, %2, %cst {dimension_numbers = #tpu.dot_dimension_numbers<[1], [0], [0], [1], [0, 0, 1, 1], [], []>} : vector<128x288xbf16>, vector<288x64xbf16>, vector<128x64xf32> -> vector<128x64xf32>
    %c0_4 = arith.constant 0 : index
    %c0_5 = arith.constant 0 : index
    %4 = vector.load %arg3[%c0_4, %c0_5] : memref<1x64xf32, #tpu.memory_space<vmem>>, vector<1x64xf32>
    %5 = vector.broadcast %4 : vector<1x64xf32> to vector<128x64xf32>
    %6 = arith.addf %3, %5 : vector<128x64xf32>
    %cst_6 = arith.constant 0.000000e+00 : f32
    %7 = vector.broadcast %cst_6 : f32 to vector<128x64xf32>
    %8 = arith.maximumf %6, %7 : vector<128x64xf32>
    %9 = vector.shape_cast %8 : vector<128x64xf32> to vector<4x32x64xf32>
    %10 = vector.extract_strided_slice %9 {offsets = [0, 0, 0], sizes = [1, 32, 64], strides = [1, 1, 1]} : vector<4x32x64xf32> to vector<1x32x64xf32>
    %11 = vector.shape_cast %10 : vector<1x32x64xf32> to vector<32x64xf32>
    %12 = vector.extract_strided_slice %9 {offsets = [1, 0, 0], sizes = [1, 32, 64], strides = [1, 1, 1]} : vector<4x32x64xf32> to vector<1x32x64xf32>
    %13 = vector.shape_cast %12 : vector<1x32x64xf32> to vector<32x64xf32>
    %14 = arith.maximumf %11, %13 : vector<32x64xf32>
    %15 = vector.extract_strided_slice %9 {offsets = [2, 0, 0], sizes = [1, 32, 64], strides = [1, 1, 1]} : vector<4x32x64xf32> to vector<1x32x64xf32>
    %16 = vector.shape_cast %15 : vector<1x32x64xf32> to vector<32x64xf32>
    %17 = vector.extract_strided_slice %9 {offsets = [3, 0, 0], sizes = [1, 32, 64], strides = [1, 1, 1]} : vector<4x32x64xf32> to vector<1x32x64xf32>
    %18 = vector.shape_cast %17 : vector<1x32x64xf32> to vector<32x64xf32>
    %19 = arith.maximumf %16, %18 : vector<32x64xf32>
    %20 = arith.maximumf %14, %19 : vector<32x64xf32>
    %21 = arith.truncf %20 : vector<32x64xf32> to vector<32x64xbf16>
    %c0_7 = arith.constant 0 : index
    %c0_8 = arith.constant 0 : index
    %22 = vector.load %arg4[%c0_7, %c0_8] : memref<32x64xbf16, #tpu.memory_space<vmem>>, vector<32x64xbf16>
    tpu.vector_store %arg4[%c0_7, %c0_8], %21 {strides = array<i32>} : memref<32x64xbf16, #tpu.memory_space<vmem>>, vector<32x64xbf16>,
    return
  }
  func.func @transform_0(%arg0: i32) -> (i32, i32, i32) {
    %c0_i32 = arith.constant 0 : i32
    %c0_i32_0 = arith.constant 0 : i32
    %c0_i32_1 = arith.constant 0 : i32
    return %c0_i32, %arg0, %c0_i32_0 : i32, i32, i32
  }
  func.func @transform_1(%arg0: i32) -> (i32, i32) {
    %c0_i32 = arith.constant 0 : i32
    %c0_i32_0 = arith.constant 0 : i32
    %c0_i32_1 = arith.constant 0 : i32
    return %c0_i32, %c0_i32_0 : i32, i32
  }
  func.func @transform_2(%arg0: i32) -> (i32, i32) {
    %c0_i32 = arith.constant 0 : i32
    %c0_i32_0 = arith.constant 0 : i32
    %c0_i32_1 = arith.constant 0 : i32
    return %c0_i32, %c0_i32_0 : i32, i32
  }
  func.func @transform_3(%arg0: i32) -> (i32, i32) {
    %c0_i32 = arith.constant 0 : i32
    %c0_i32_0 = arith.constant 0 : i32
    return %arg0, %c0_i32 : i32, i32
  }
}

module attributes {stable_mosaic.version = 11 : i64} {
  func.func @_conv_relu_pool_kernel(%arg0: i32, %arg1: memref<4x16x576xbf16, #tpu.memory_space<vmem>>, %arg2: memref<576x128xbf16, #tpu.memory_space<vmem>>, %arg3: memref<1x128xf32, #tpu.memory_space<vmem>>, %arg4: memref<16x128xbf16, #tpu.memory_space<vmem>>) attributes {dimension_semantics = [#tpu.dimension_semantics<parallel>], iteration_bounds = array<i64: 1>, scalar_prefetch = 0 : i64, scratch_operands = 0 : i64, tpu.core_type = #tpu.core_type<tc>, window_params = [{transform_indices = @transform_0, window_bounds = array<i64: 4, 16, 576>}, {pipeline_mode = #tpu.pipeline_mode<synchronous>, transform_indices = @transform_1, window_bounds = array<i64: 576, 128>}, {pipeline_mode = #tpu.pipeline_mode<synchronous>, transform_indices = @transform_2, window_bounds = array<i64: 1, 128>}, {transform_indices = @transform_3, window_bounds = array<i64: 16, 128>}]} {
    %c0 = arith.constant 0 : index
    %c0_0 = arith.constant 0 : index
    %c0_1 = arith.constant 0 : index
    %0 = vector.load %arg1[%c0, %c0_0, %c0_1] : memref<4x16x576xbf16, #tpu.memory_space<vmem>>, vector<4x16x576xbf16>
    %1 = vector.shape_cast %0 : vector<4x16x576xbf16> to vector<64x576xbf16>
    %c0_2 = arith.constant 0 : index
    %c0_3 = arith.constant 0 : index
    %2 = vector.load %arg2[%c0_2, %c0_3] : memref<576x128xbf16, #tpu.memory_space<vmem>>, vector<576x128xbf16>
    %cst = arith.constant dense<0.000000e+00> : vector<64x128xf32>
    %3 = tpu.matmul %1, %2, %cst {dimension_numbers = #tpu.dot_dimension_numbers<[1], [0], [0], [1], [0, 0, 1, 1], [], []>} : vector<64x576xbf16>, vector<576x128xbf16>, vector<64x128xf32> -> vector<64x128xf32>
    %c0_4 = arith.constant 0 : index
    %c0_5 = arith.constant 0 : index
    %4 = vector.load %arg3[%c0_4, %c0_5] : memref<1x128xf32, #tpu.memory_space<vmem>>, vector<1x128xf32>
    %5 = vector.broadcast %4 : vector<1x128xf32> to vector<64x128xf32>
    %6 = arith.addf %3, %5 : vector<64x128xf32>
    %cst_6 = arith.constant 0.000000e+00 : f32
    %7 = vector.broadcast %cst_6 : f32 to vector<64x128xf32>
    %8 = arith.maximumf %6, %7 : vector<64x128xf32>
    %9 = vector.shape_cast %8 : vector<64x128xf32> to vector<4x16x128xf32>
    %10 = vector.extract_strided_slice %9 {offsets = [0, 0, 0], sizes = [1, 16, 128], strides = [1, 1, 1]} : vector<4x16x128xf32> to vector<1x16x128xf32>
    %11 = vector.shape_cast %10 : vector<1x16x128xf32> to vector<16x128xf32>
    %12 = vector.extract_strided_slice %9 {offsets = [1, 0, 0], sizes = [1, 16, 128], strides = [1, 1, 1]} : vector<4x16x128xf32> to vector<1x16x128xf32>
    %13 = vector.shape_cast %12 : vector<1x16x128xf32> to vector<16x128xf32>
    %14 = arith.maximumf %11, %13 : vector<16x128xf32>
    %15 = vector.extract_strided_slice %9 {offsets = [2, 0, 0], sizes = [1, 16, 128], strides = [1, 1, 1]} : vector<4x16x128xf32> to vector<1x16x128xf32>
    %16 = vector.shape_cast %15 : vector<1x16x128xf32> to vector<16x128xf32>
    %17 = vector.extract_strided_slice %9 {offsets = [3, 0, 0], sizes = [1, 16, 128], strides = [1, 1, 1]} : vector<4x16x128xf32> to vector<1x16x128xf32>
    %18 = vector.shape_cast %17 : vector<1x16x128xf32> to vector<16x128xf32>
    %19 = arith.maximumf %16, %18 : vector<16x128xf32>
    %20 = arith.maximumf %14, %19 : vector<16x128xf32>
    %21 = arith.truncf %20 : vector<16x128xf32> to vector<16x128xbf16>
    %c0_7 = arith.constant 0 : index
    %c0_8 = arith.constant 0 : index
    %22 = vector.load %arg4[%c0_7, %c0_8] : memref<16x128xbf16, #tpu.memory_space<vmem>>, vector<16x128xbf16>
    tpu.vector_store %arg4[%c0_7, %c0_8], %21 {strides = array<i32>} : memref<16x128xbf16, #tpu.memory_space<vmem>>, vector<16x128xbf16>,
    return
  }
  func.func @transform_0(%arg0: i32) -> (i32, i32, i32) {
    %c0_i32 = arith.constant 0 : i32
    %c0_i32_0 = arith.constant 0 : i32
    %c0_i32_1 = arith.constant 0 : i32
    return %c0_i32, %arg0, %c0_i32_0 : i32, i32, i32
  }
  func.func @transform_1(%arg0: i32) -> (i32, i32) {
    %c0_i32 = arith.constant 0 : i32
    %c0_i32_0 = arith.constant 0 : i32
    %c0_i32_1 = arith.constant 0 : i32
    return %c0_i32, %c0_i32_0 : i32, i32
  }
  func.func @transform_2(%arg0: i32) -> (i32, i32) {
    %c0_i32 = arith.constant 0 : i32
    %c0_i32_0 = arith.constant 0 : i32
    %c0_i32_1 = arith.constant 0 : i32
    return %c0_i32, %c0_i32_0 : i32, i32
  }
  func.func @transform_3(%arg0: i32) -> (i32, i32) {
    %c0_i32 = arith.constant 0 : i32
    %c0_i32_0 = arith.constant 0 : i32
    return %arg0, %c0_i32 : i32, i32
  }
}

module attributes {stable_mosaic.version = 11 : i64} {
  func.func @_convt_phase_kernel(%arg0: i32, %arg1: memref<16x512xbf16, #tpu.memory_space<vmem>>, %arg2: memref<512x256xbf16, #tpu.memory_space<vmem>>, %arg3: memref<1x256xf32, #tpu.memory_space<vmem>>, %arg4: memref<16x256xbf16, #tpu.memory_space<vmem>>) attributes {dimension_semantics = [#tpu.dimension_semantics<parallel>], iteration_bounds = array<i64: 1>, scalar_prefetch = 0 : i64, scratch_operands = 0 : i64, tpu.core_type = #tpu.core_type<tc>, window_params = [{transform_indices = @transform_0, window_bounds = array<i64: 16, 512>}, {pipeline_mode = #tpu.pipeline_mode<synchronous>, transform_indices = @transform_1, window_bounds = array<i64: 512, 256>}, {pipeline_mode = #tpu.pipeline_mode<synchronous>, transform_indices = @transform_2, window_bounds = array<i64: 1, 256>}, {transform_indices = @transform_3, window_bounds = array<i64: 16, 256>}]} {
    %c0 = arith.constant 0 : index
    %c0_0 = arith.constant 0 : index
    %0 = vector.load %arg1[%c0, %c0_0] : memref<16x512xbf16, #tpu.memory_space<vmem>>, vector<16x512xbf16>
    %c0_1 = arith.constant 0 : index
    %c0_2 = arith.constant 0 : index
    %1 = vector.load %arg2[%c0_1, %c0_2] : memref<512x256xbf16, #tpu.memory_space<vmem>>, vector<512x256xbf16>
    %cst = arith.constant dense<0.000000e+00> : vector<16x256xf32>
    %2 = tpu.matmul %0, %1, %cst {dimension_numbers = #tpu.dot_dimension_numbers<[1], [0], [0], [1], [0, 0, 1, 1], [], []>} : vector<16x512xbf16>, vector<512x256xbf16>, vector<16x256xf32> -> vector<16x256xf32>
    %c0_3 = arith.constant 0 : index
    %c0_4 = arith.constant 0 : index
    %3 = vector.load %arg3[%c0_3, %c0_4] : memref<1x256xf32, #tpu.memory_space<vmem>>, vector<1x256xf32>
    %4 = vector.broadcast %3 : vector<1x256xf32> to vector<16x256xf32>
    %5 = arith.addf %2, %4 : vector<16x256xf32>
    %cst_5 = arith.constant 0.000000e+00 : f32
    %6 = vector.broadcast %cst_5 : f32 to vector<16x256xf32>
    %7 = arith.maximumf %5, %6 : vector<16x256xf32>
    %8 = arith.truncf %7 : vector<16x256xf32> to vector<16x256xbf16>
    %c0_6 = arith.constant 0 : index
    %c0_7 = arith.constant 0 : index
    %9 = vector.load %arg4[%c0_6, %c0_7] : memref<16x256xbf16, #tpu.memory_space<vmem>>, vector<16x256xbf16>
    tpu.vector_store %arg4[%c0_6, %c0_7], %8 {strides = array<i32>} : memref<16x256xbf16, #tpu.memory_space<vmem>>, vector<16x256xbf16>,
    return
  }
  func.func @transform_0(%arg0: i32) -> (i32, i32) {
    %c0_i32 = arith.constant 0 : i32
    %c0_i32_0 = arith.constant 0 : i32
    return %arg0, %c0_i32 : i32, i32
  }
  func.func @transform_1(%arg0: i32) -> (i32, i32) {
    %c0_i32 = arith.constant 0 : i32
    %c0_i32_0 = arith.constant 0 : i32
    %c0_i32_1 = arith.constant 0 : i32
    return %c0_i32, %c0_i32_0 : i32, i32
  }
  func.func @transform_2(%arg0: i32) -> (i32, i32) {
    %c0_i32 = arith.constant 0 : i32
    %c0_i32_0 = arith.constant 0 : i32
    %c0_i32_1 = arith.constant 0 : i32
    return %c0_i32, %c0_i32_0 : i32, i32
  }
  func.func @transform_3(%arg0: i32) -> (i32, i32) {
    %c0_i32 = arith.constant 0 : i32
    %c0_i32_0 = arith.constant 0 : i32
    return %arg0, %c0_i32 : i32, i32
  }
}

module attributes {stable_mosaic.version = 11 : i64} {
  func.func @_convt_phase_kernel(%arg0: i32, %arg1: memref<32x256xbf16, #tpu.memory_space<vmem>>, %arg2: memref<256x128xbf16, #tpu.memory_space<vmem>>, %arg3: memref<1x128xf32, #tpu.memory_space<vmem>>, %arg4: memref<32x128xbf16, #tpu.memory_space<vmem>>) attributes {dimension_semantics = [#tpu.dimension_semantics<parallel>], iteration_bounds = array<i64: 1>, scalar_prefetch = 0 : i64, scratch_operands = 0 : i64, tpu.core_type = #tpu.core_type<tc>, window_params = [{transform_indices = @transform_0, window_bounds = array<i64: 32, 256>}, {pipeline_mode = #tpu.pipeline_mode<synchronous>, transform_indices = @transform_1, window_bounds = array<i64: 256, 128>}, {pipeline_mode = #tpu.pipeline_mode<synchronous>, transform_indices = @transform_2, window_bounds = array<i64: 1, 128>}, {transform_indices = @transform_3, window_bounds = array<i64: 32, 128>}]} {
    %c0 = arith.constant 0 : index
    %c0_0 = arith.constant 0 : index
    %0 = vector.load %arg1[%c0, %c0_0] : memref<32x256xbf16, #tpu.memory_space<vmem>>, vector<32x256xbf16>
    %c0_1 = arith.constant 0 : index
    %c0_2 = arith.constant 0 : index
    %1 = vector.load %arg2[%c0_1, %c0_2] : memref<256x128xbf16, #tpu.memory_space<vmem>>, vector<256x128xbf16>
    %cst = arith.constant dense<0.000000e+00> : vector<32x128xf32>
    %2 = tpu.matmul %0, %1, %cst {dimension_numbers = #tpu.dot_dimension_numbers<[1], [0], [0], [1], [0, 0, 1, 1], [], []>} : vector<32x256xbf16>, vector<256x128xbf16>, vector<32x128xf32> -> vector<32x128xf32>
    %c0_3 = arith.constant 0 : index
    %c0_4 = arith.constant 0 : index
    %3 = vector.load %arg3[%c0_3, %c0_4] : memref<1x128xf32, #tpu.memory_space<vmem>>, vector<1x128xf32>
    %4 = vector.broadcast %3 : vector<1x128xf32> to vector<32x128xf32>
    %5 = arith.addf %2, %4 : vector<32x128xf32>
    %cst_5 = arith.constant 0.000000e+00 : f32
    %6 = vector.broadcast %cst_5 : f32 to vector<32x128xf32>
    %7 = arith.maximumf %5, %6 : vector<32x128xf32>
    %8 = arith.truncf %7 : vector<32x128xf32> to vector<32x128xbf16>
    %c0_6 = arith.constant 0 : index
    %c0_7 = arith.constant 0 : index
    %9 = vector.load %arg4[%c0_6, %c0_7] : memref<32x128xbf16, #tpu.memory_space<vmem>>, vector<32x128xbf16>
    tpu.vector_store %arg4[%c0_6, %c0_7], %8 {strides = array<i32>} : memref<32x128xbf16, #tpu.memory_space<vmem>>, vector<32x128xbf16>,
    return
  }
  func.func @transform_0(%arg0: i32) -> (i32, i32) {
    %c0_i32 = arith.constant 0 : i32
    %c0_i32_0 = arith.constant 0 : i32
    return %arg0, %c0_i32 : i32, i32
  }
  func.func @transform_1(%arg0: i32) -> (i32, i32) {
    %c0_i32 = arith.constant 0 : i32
    %c0_i32_0 = arith.constant 0 : i32
    %c0_i32_1 = arith.constant 0 : i32
    return %c0_i32, %c0_i32_0 : i32, i32
  }
  func.func @transform_2(%arg0: i32) -> (i32, i32) {
    %c0_i32 = arith.constant 0 : i32
    %c0_i32_0 = arith.constant 0 : i32
    %c0_i32_1 = arith.constant 0 : i32
    return %c0_i32, %c0_i32_0 : i32, i32
  }
  func.func @transform_3(%arg0: i32) -> (i32, i32) {
    %c0_i32 = arith.constant 0 : i32
    %c0_i32_0 = arith.constant 0 : i32
    return %arg0, %c0_i32 : i32, i32
  }
}

module attributes {stable_mosaic.version = 11 : i64} {
  func.func @_convt_phase_kernel(%arg0: i32, %arg1: memref<128x128xbf16, #tpu.memory_space<vmem>>, %arg2: memref<128x4xbf16, #tpu.memory_space<vmem>>, %arg3: memref<1x4xf32, #tpu.memory_space<vmem>>, %arg4: memref<128x4xf32, #tpu.memory_space<vmem>>) attributes {dimension_semantics = [#tpu.dimension_semantics<parallel>], iteration_bounds = array<i64: 1>, scalar_prefetch = 0 : i64, scratch_operands = 0 : i64, tpu.core_type = #tpu.core_type<tc>, window_params = [{transform_indices = @transform_0, window_bounds = array<i64: 128, 128>}, {pipeline_mode = #tpu.pipeline_mode<synchronous>, transform_indices = @transform_1, window_bounds = array<i64: 128, 4>}, {pipeline_mode = #tpu.pipeline_mode<synchronous>, transform_indices = @transform_2, window_bounds = array<i64: 1, 4>}, {transform_indices = @transform_3, window_bounds = array<i64: 128, 4>}]} {
    %c0 = arith.constant 0 : index
    %c0_0 = arith.constant 0 : index
    %0 = vector.load %arg1[%c0, %c0_0] : memref<128x128xbf16, #tpu.memory_space<vmem>>, vector<128x128xbf16>
    %c0_1 = arith.constant 0 : index
    %c0_2 = arith.constant 0 : index
    %1 = vector.load %arg2[%c0_1, %c0_2] : memref<128x4xbf16, #tpu.memory_space<vmem>>, vector<128x4xbf16>
    %cst = arith.constant dense<0.000000e+00> : vector<128x4xf32>
    %2 = tpu.matmul %0, %1, %cst {dimension_numbers = #tpu.dot_dimension_numbers<[1], [0], [0], [1], [0, 0, 1, 1], [], []>} : vector<128x128xbf16>, vector<128x4xbf16>, vector<128x4xf32> -> vector<128x4xf32>
    %c0_3 = arith.constant 0 : index
    %c0_4 = arith.constant 0 : index
    %3 = vector.load %arg3[%c0_3, %c0_4] : memref<1x4xf32, #tpu.memory_space<vmem>>, vector<1x4xf32>
    %4 = vector.broadcast %3 : vector<1x4xf32> to vector<128x4xf32>
    %5 = arith.addf %2, %4 : vector<128x4xf32>
    %cst_5 = arith.constant 0.000000e+00 : f32
    %6 = vector.broadcast %cst_5 : f32 to vector<128x4xf32>
    %7 = arith.subf %6, %5 : vector<128x4xf32>
    %8 = math.exp %7 : vector<128x4xf32>
    %cst_6 = arith.constant 1.000000e+00 : f32
    %9 = vector.broadcast %cst_6 : f32 to vector<128x4xf32>
    %10 = arith.addf %9, %8 : vector<128x4xf32>
    %11 = tpu.reciprocal %10 {approx = true} : vector<128x4xf32> -> vector<128x4xf32>
    %c0_7 = arith.constant 0 : index
    %c0_8 = arith.constant 0 : index
    %12 = vector.load %arg4[%c0_7, %c0_8] : memref<128x4xf32, #tpu.memory_space<vmem>>, vector<128x4xf32>
    tpu.vector_store %arg4[%c0_7, %c0_8], %11 {strides = array<i32>} : memref<128x4xf32, #tpu.memory_space<vmem>>, vector<128x4xf32>,
    return
  }
  func.func @transform_0(%arg0: i32) -> (i32, i32) {
    %c0_i32 = arith.constant 0 : i32
    %c0_i32_0 = arith.constant 0 : i32
    return %arg0, %c0_i32 : i32, i32
  }
  func.func @transform_1(%arg0: i32) -> (i32, i32) {
    %c0_i32 = arith.constant 0 : i32
    %c0_i32_0 = arith.constant 0 : i32
    %c0_i32_1 = arith.constant 0 : i32
    return %c0_i32, %c0_i32_0 : i32, i32
  }
  func.func @transform_2(%arg0: i32) -> (i32, i32) {
    %c0_i32 = arith.constant 0 : i32
    %c0_i32_0 = arith.constant 0 : i32
    %c0_i32_1 = arith.constant 0 : i32
    return %c0_i32, %c0_i32_0 : i32, i32
  }
  func.func @transform_3(%arg0: i32) -> (i32, i32) {
    %c0_i32 = arith.constant 0 : i32
    %c0_i32_0 = arith.constant 0 : i32
    return %arg0, %c0_i32 : i32, i32
  }
}

</mosaic_0001>

<bundles_post_ra>
// kernel: autoencoder_forward.6
= control target key start
LH: loop header
LB: loop body
LE: loop exit
PB: predicated region body
PF: predicated region fallthrough
CT: control target
= control target key end

     0   :  { %vm358_vm0 = vcmask 1044480   ;;  %vm359_vm1 = vcmask 1045504   ;;  %vm261_vm2 = vcmask 220160   ;;  %v1091_v1 = vmov 65535   ;;  %s1537_s1 = inlined_call_operand.vmem [shape: bf16[27,32], index: 1, kind: input, shape index: {}]   ;;  %s1538_s0 = inlined_call_operand.vmem [shape: bf16[4,128,27], index: 0, kind: input, shape index: {}]   ;;  %s1539_s2 = inlined_call_operand.vmem [shape: f32[1,32], index: 2, kind: input, shape index: {}]   ;;  %s1540_s3 = inlined_call_operand.vmem [shape: bf16[128,32], index: 3, kind: output, shape index: {}]  }
   0x1   :  { %v1057_v0 = vld [vmem:[%s1537_s1] sm:$0xff]   ;;  %v360_v2 = vsel %vm358_vm0, 4294967295, %v1091_v1  ;;  %v1058_v3 = vld [vmem:[%s1537_s1 + $0x8] sm:$0x3f]   ;;  %v1063_v10 = vld [vmem:[%s1538_s0 + $0x10] sm:$0xff]   ;;  %vm830_vm3 = vcmask 257024  }
   0x2   :  { %984 = vmatprep.subr.bf16.mxu0 %v1057_v0  ;;  %1052 = vmatprep.subr.bf16.mxu1 %v1057_v0  ;;  %v361_v4 = vsel %vm359_vm1, %v360_v2, 0  ;;  %v1059_v5 = vld [vmem:[%s1538_s0] sm:$0xff]   ;;  %v1061_v8 = vld [vmem:[%s1538_s0 + $0x8] sm:$0xff]   ;;  %v1064_v11 = vld [vmem:[%s1538_s0 + $0x90] sm:$0xff]  }
   0x3   :  { %985 = vmatpush3.bf16.msra.mxu0 %v1057_v0  ;;  %1054 = vmatpush3.bf16.msra.mxu1 %v1057_v0  ;;  %v363_v6 = vand.u32 %v1058_v3, %v361_v4  ;;  %v1060_v7 = vld [vmem:[%s1538_s0 + $0x80] sm:$0xff]   ;;  %v1062_v9 = vld [vmem:[%s1538_s0 + $0x88] sm:$0xff]   ;;  %v1065_v12 = vld [vmem:[%s1538_s0 + $0x18] sm:$0xff]  }
   0x4   :  { %988 = vmatprep.mubr.msk.bf16.mxu0 %vm261_vm2, %v1059_v5  ;;  %1020 = vmatprep.mubr.msk.bf16.mxu1 %vm261_vm2, %v1060_v7  ;;  %v1066_v13 = vld [vmem:[%s1538_s0 + $0x98] sm:$0xff]   ;;  %v1067_v14 = vld [vmem:[%s1538_s0 + $0x20] sm:$0xff]   ;;  %v1069_v16 = vld [vmem:[%s1538_s0 + $0x28] sm:$0xff]  }
   0x5   :  { %986 = vmatprep.subr.bf16.mxu0 %v363_v6  ;;  %1053 = vmatprep.subr.bf16.mxu1 %v363_v6  ;;  %v1068_v15 = vld [vmem:[%s1538_s0 + $0xa0] sm:$0xff]   ;;  %v1070_v17 = vld [vmem:[%s1538_s0 + $0xa8] sm:$0xff]   ;;  %v1071_v18 = vld [vmem:[%s1538_s0 + $0x30] sm:$0xff]  }
   0x6   :  { %v1072_v19 = vld [vmem:[%s1538_s0 + $0xb0] sm:$0xff]   ;;  %v1073_v20 = vld [vmem:[%s1538_s0 + $0x38] sm:$0xff]   ;;  %v1075_v22 = vld [vmem:[%s1538_s0 + $0x40] sm:$0xff]  }
   0x7   :  { %987 = vmatpush3.bf16.msra.mxu0 %v363_v6  ;;  %1055 = vmatpush3.bf16.msra.mxu1 %v363_v6  ;;  %v1074_v21 = vld [vmem:[%s1538_s0 + $0xb8] sm:$0xff]   ;;  %v1076_v23 = vld [vmem:[%s1538_s0 + $0xc0] sm:$0xff]   ;;  %v1077_v24 = vld [vmem:[%s1538_s0 + $0x48] sm:$0xff]  }
   0x8   :  { %v1078_v25 = vld [vmem:[%s1538_s0 + $0xc8] sm:$0xff]   ;;  %v1079_v26 = vld [vmem:[%s1538_s0 + $0x50] sm:$0xff]   ;;  %v1081_v28 = vld [vmem:[%s1538_s0 + $0x58] sm:$0xff]  }
   0x9   :  { %v1080_v27 = vld [vmem:[%s1538_s0 + $0xd0] sm:$0xff]   ;;  %v1082_v29 = vld [vmem:[%s1538_s0 + $0xd8] sm:$0xff]   ;;  %v1083_v30 = vld [vmem:[%s1538_s0 + $0x60] sm:$0xff]  }
   0xa   :  { %989 = vmatmul.mubr.msk.bf16.vlgmr.msra.gmra.mrb[0].mxu0 %vm261_vm2, %v1061_v8  ;;  %1021 = vmatmul.mubr.msk.bf16.vlgmr.msra.gmra.mrb[0].mxu1 %vm261_vm2, %v1062_v9  ;;  %v1084_v31 = vld [vmem:[%s1538_s0 + $0xe0] sm:$0xff]   ;;  %v1085_v32 = vld [vmem:[%s1538_s0 + $0x68] sm:$0xff]   ;;  %v1087_v34 = vld [vmem:[%s1538_s0 + $0x70] sm:$0xff]  }
   0xb   :  { %992 = vmatprep.mubr.msk.bf16.mxu0 %vm261_vm2, %v1063_v10  ;;  %1024 = vmatprep.mubr.msk.bf16.mxu1 %vm261_vm2, %v1064_v11  ;;  %v1086_v33 = vld [vmem:[%s1538_s0 + $0xe8] sm:$0xff]   ;;  %v1088_v35 = vld [vmem:[%s1538_s0 + $0xf0] sm:$0xff]   ;;  %v1089_v36 = vld [vmem:[%s1538_s0 + $0x78] sm:$0xff]  }
   0xc   :  { %v1090_v37 = vld [vmem:[%s1538_s0 + $0xf8] sm:$0xff]   ;;  %v1249_v54 = vld [vmem:[%s1539_s2] ss:$0 sm:$0xff] }
  0x12   :  { %993 = vmatmul.mubr.msk.bf16.gmra.mrb[4].mxu0 %vm261_vm2, %v1065_v12  ;;  %1025 = vmatmul.mubr.msk.bf16.gmra.mrb[4].mxu1 %vm261_vm2, %v1066_v13 }
  0x13   :  { %996 = vmatprep.mubr.msk.bf16.mxu0 %vm261_vm2, %v1067_v14  ;;  %1028 = vmatprep.mubr.msk.bf16.mxu1 %vm261_vm2, %v1068_v15 }
  0x1a   :  { %997 = vmatmul.mubr.msk.bf16.gmra.mrb[8].mxu0 %vm261_vm2, %v1069_v16  ;;  %1029 = vmatmul.mubr.msk.bf16.gmra.mrb[8].mxu1 %vm261_vm2, %v1070_v17 }
  0x1b   :  { %1000 = vmatprep.mubr.msk.bf16.mxu0 %vm261_vm2, %v1071_v18  ;;  %1032 = vmatprep.mubr.msk.bf16.mxu1 %vm261_vm2, %v1072_v19 }
  0x22   :  { %1001 = vmatmul.mubr.msk.bf16.gmra.mrb[12].mxu0 %vm261_vm2, %v1073_v20  ;;  %1033 = vmatmul.mubr.msk.bf16.gmra.mrb[12].mxu1 %vm261_vm2, %v1074_v21 }
  0x23   :  { %1004 = vmatprep.mubr.msk.bf16.mxu0 %vm261_vm2, %v1075_v22  ;;  %1036 = vmatprep.mubr.msk.bf16.mxu1 %vm261_vm2, %v1076_v23 }
  0x2a   :  { %1005 = vmatmul.mubr.msk.bf16.gmra.mrb[16].mxu0 %vm261_vm2, %v1077_v24  ;;  %1037 = vmatmul.mubr.msk.bf16.gmra.mrb[16].mxu1 %vm261_vm2, %v1078_v25 }
  0x2b   :  { %1008 = vmatprep.mubr.msk.bf16.mxu0 %vm261_vm2, %v1079_v26  ;;  %1040 = vmatprep.mubr.msk.bf16.mxu1 %vm261_vm2, %v1080_v27 }
  0x32   :  { %1009 = vmatmul.mubr.msk.bf16.gmra.mrb[20].mxu0 %vm261_vm2, %v1081_v28  ;;  %1041 = vmatmul.mubr.msk.bf16.gmra.mrb[20].mxu1 %vm261_vm2, %v1082_v29 }
  0x33   :  { %1012 = vmatprep.mubr.msk.bf16.mxu0 %vm261_vm2, %v1083_v30  ;;  %1044 = vmatprep.mubr.msk.bf16.mxu1 %vm261_vm2, %v1084_v31 }
  0x3a   :  { %1013 = vmatmul.mubr.msk.bf16.gmra.mrb[24].mxu0 %vm261_vm2, %v1085_v32  ;;  %1045 = vmatmul.mubr.msk.bf16.gmra.mrb[24].mxu1 %vm261_vm2, %v1086_v33 }
  0x3b   :  { %1016 = vmatprep.mubr.msk.bf16.mxu0 %vm261_vm2, %v1087_v34  ;;  %1048 = vmatprep.mubr.msk.bf16.mxu1 %vm261_vm2, %v1088_v35 }
  0x42   :  { %1017 = vmatmul.mubr.msk.bf16.gmra.mrb[28].mxu0 %vm261_vm2, %v1089_v36  ;;  %1049 = vmatmul.mubr.msk.bf16.gmra.mrb[28].mxu1 %vm261_vm2, %v1090_v37 }
  0xdd   :  { %v990_v38 = vpop.f32.mrb[0].mxu0  ;;  %v1022_v39 = vpop.f32.mrb[0].mxu1 }
  0xde   :  { %v399_v40 = vpop.f32.mrb[1].mxu0  ;;  %v527_v41 = vpop.f32.mrb[1].mxu1  ;;  %v1252_v59 = vadd.f32 %v990_v38, %v1249_v54  ;;  %v1255_v60 = vadd.f32 %v1022_v39, %v1249_v54 }
  0xdf   :  { %v991_v42 = vpop.f32.mrb[2].mxu0  ;;  %v1023_v43 = vpop.f32.mrb[2].mxu1  ;;  %v1258_v63 = vadd.f32 %v1249_v54, %v399_v40  ;;  %v1261_v0 = vadd.f32 %v1249_v54, %v527_v41 }
  0xe0   :  { %v402_v44 = vpop.f32.mrb[3].mxu0  ;;  %v530_v45 = vpop.f32.mrb[3].mxu1  ;;  %v1264_v1 = vadd.f32 %v991_v42, %v1249_v54  ;;  %v1267_v2 = vadd.f32 %v1023_v43, %v1249_v54  ;;  %v656_v9 = vmax.f32 %v1252_v59, 0.0  ;;  %v688_v10 = vmax.f32 %v1255_v60, 0.0 }
  0xe1   :  { %v1270_v5 = vadd.f32 %v1249_v54, %v402_v44  ;;  %v1273_v6 = vadd.f32 %v1249_v54, %v530_v45  ;;  %v654_v11 = vmax.f32 %v1258_v63, 0.0  ;;  %v686_v12 = vmax.f32 %v1261_v0, 0.0 }
  0xe2   :  { %v657_v13 = vmax.f32 %v1264_v1, 0.0  ;;  %v689_v14 = vmax.f32 %v1267_v2, 0.0 }
  0xe3   :  { %v655_v15 = vmax.f32 %v1270_v5, 0.0  ;;  %v687_v16 = vmax.f32 %v1273_v6, 0.0 }
  0xe5   :  { %v994_v46 = vpop.f32.mrb[4].mxu0  ;;  %v1026_v47 = vpop.f32.mrb[4].mxu1 }
  0xe6   :  { %v415_v48 = vpop.f32.mrb[5].mxu0  ;;  %v543_v49 = vpop.f32.mrb[5].mxu1  ;;  %v1276_v7 = vadd.f32 %v994_v46, %v1249_v54  ;;  %v1279_v8 = vadd.f32 %v1026_v47, %v1249_v54 }
  0xe7   :  { %v995_v50 = vpop.f32.mrb[6].mxu0  ;;  %v1027_v51 = vpop.f32.mrb[6].mxu1  ;;  %v1290_v17 = vadd.f32 %v1249_v54, %v415_v48  ;;  %v1293_v18 = vadd.f32 %v1249_v54, %v543_v49 }
  0xe8   :  { %v418_v52 = vpop.f32.mrb[7].mxu0  ;;  %v546_v53 = vpop.f32.mrb[7].mxu1  ;;  %v660_v21 = vmax.f32 %v1276_v7, 0.0  ;;  %v692_v22 = vmax.f32 %v1279_v8, 0.0  ;;  %v1298_v23 = vadd.f32 %v995_v50, %v1249_v54  ;;  %v1301_v24 = vadd.f32 %v1027_v51, %v1249_v54 }
  0xe9   :  { %v1304_v27 = vadd.f32 %v1249_v54, %v418_v52  ;;  %v1307_v28 = vadd.f32 %v1249_v54, %v546_v53  ;;  %v658_v39 = vmax.f32 %v1290_v17, 0.0  ;;  %v690_v40 = vmax.f32 %v1293_v18, 0.0 }
  0xea   :  { %v1542_v18 = vmax.f32 %v1301_v24, 0.0 }
  0xed   :  { %v998_v55 = vpop.f32.mrb[8].mxu0  ;;  %v1030_v56 = vpop.f32.mrb[8].mxu1 }
  0xee   :  { %v431_v57 = vpop.f32.mrb[9].mxu0  ;;  %v559_v58 = vpop.f32.mrb[9].mxu1  ;;  %v1310_v29 = vadd.f32 %v998_v55, %v1249_v54  ;;  %v1313_v30 = vadd.f32 %v1030_v56, %v1249_v54 }
  0xef   :  { %v999_v61 = vpop.f32.mrb[10].mxu0  ;;  %v1031_v62 = vpop.f32.mrb[10].mxu1  ;;  %v1316_v33 = vadd.f32 %v1249_v54, %v431_v57  ;;  %v1319_v34 = vadd.f32 %v1249_v54, %v559_v58 }
  0xf0   :  { %v434_v3 = vpop.f32.mrb[11].mxu0  ;;  %v562_v4 = vpop.f32.mrb[11].mxu1  ;;  %v1322_v35 = vadd.f32 %v999_v61, %v1249_v54  ;;  %v1325_v36 = vadd.f32 %v1031_v62, %v1249_v54 }
  0xf1   :  { %v1334_v41 = vadd.f32 %v1249_v54, %v434_v3  ;;  %v1337_v42 = vadd.f32 %v1249_v54, %v562_v4 }
  0xf5   :  { %v1002_v19 = vpop.f32.mrb[12].mxu0  ;;  %v1034_v20 = vpop.f32.mrb[12].mxu1 }
  0xf6   :  { %v447_v25 = vpop.f32.mrb[13].mxu0  ;;  %v575_v26 = vpop.f32.mrb[13].mxu1  ;;  %v1342_v45 = vadd.f32 %v1002_v19, %v1249_v54  ;;  %v1345_v46 = vadd.f32 %v1034_v20, %v1249_v54 }
  0xf7   :  { %v1003_v31 = vpop.f32.mrb[14].mxu0  ;;  %v1035_v32 = vpop.f32.mrb[14].mxu1  ;;  %v1358_v58 = vadd.f32 %v1249_v54, %v447_v25  ;;  %v1361_v61 = vadd.f32 %v1249_v54, %v575_v26 }
  0xf8   :  { %v1327_v37 = vpop.f32.mrb[15].mxu0  ;;  %v1329_v38 = vpop.f32.mrb[15].mxu1  ;;  %v1368_v57 = vadd.f32 %v1003_v31, %v1249_v54  ;;  %v1371_v25 = vadd.f32 %v1035_v32, %v1249_v54 }
  0xf9   :  { %v1431_v8 = vadd.f32 %v1249_v54, %v1327_v37  ;;  %v1543_v37 = vmax.f32 %v1304_v27, 0.0 }
  0xfd   :  { %v1006_v62 = vpop.f32.mrb[16].mxu0  ;;  %v1038_v3 = vpop.f32.mrb[16].mxu1 }
  0xfe   :  { %v472_v20 = vadd.f32 %v1006_v62, %v1249_v54  ;;  %v600_v55 = vadd.f32 %v1038_v3, %v1249_v54  ;;  %v463_v56 = vpop.f32.mrb[17].mxu0  ;;  %v591_v53 = vpop.f32.mrb[17].mxu1 }
  0xff   :  { %v464_v26 = vadd.f32 %v1249_v54, %v463_v56  ;;  %v592_v52 = vadd.f32 %v1249_v54, %v591_v53  ;;  %v1007_v51 = vpop.f32.mrb[18].mxu0  ;;  %v1039_v4 = vpop.f32.mrb[18].mxu1 }
 0x100   :  { %v672_v50 = vmax.f32 %v472_v20, 0.0  ;;  %v704_v19 = vmax.f32 %v600_v55, 0.0  ;;  %v475_v62 = vadd.f32 %v1007_v51, %v1249_v54  ;;  %v603_v3 = vadd.f32 %v1039_v4, %v1249_v54  ;;  %v466_v49 = vpop.f32.mrb[19].mxu0  ;;  %v594_v48 = vpop.f32.mrb[19].mxu1 }
 0x101   :  { %v670_v47 = vmax.f32 %v464_v26, 0.0  ;;  %v702_v31 = vmax.f32 %v592_v52, 0.0  ;;  %v467_v44 = vadd.f32 %v1249_v54, %v466_v49  ;;  %v595_v32 = vadd.f32 %v1249_v54, %v594_v48 }
 0x102   :  { %v720_v56 = vmax.f32 %v656_v9, %v672_v50  ;;  %v736_v53 = vmax.f32 %v688_v10, %v704_v19  ;;  %v673_v20 = vmax.f32 %v475_v62, 0.0  ;;  %v705_v55 = vmax.f32 %v603_v3, 0.0 }
 0x103   :  { %v718_v51 = vmax.f32 %v654_v11, %v670_v47  ;;  %v734_v4 = vmax.f32 %v686_v12, %v702_v31  ;;  %v671_v26 = vmax.f32 %v467_v44, 0.0  ;;  %v703_v52 = vmax.f32 %v595_v32, 0.0 }
 0x104   :  { %v666_v49 = vmax.f32 %v1358_v58, 0.0  ;;  %v752_v43 = vmax.f32 %v720_v56, %v736_v53  ;;  %v721_v59 = vmax.f32 %v657_v13, %v673_v20  ;;  %v737_v60 = vmax.f32 %v689_v14, %v705_v55 }
 0x105   :  { %v698_v9 = vmax.f32 %v1361_v61, 0.0  ;;  %v750_v10 = vmax.f32 %v718_v51, %v734_v4  ;;  %v719_v63 = vmax.f32 %v655_v15, %v671_v26  ;;  %v735_v0 = vmax.f32 %v687_v16, %v703_v52  ;;  %v1010_v11 = vpop.f32.mrb[20].mxu0  ;;  %v1042_v12 = vpop.f32.mrb[20].mxu1 }
 0x106   :  { %v936_v44 = vpack.c.bf16 %v752_v43, %v752_v43  ;;  %v753_v47 = vmax.f32 %v721_v59, %v737_v60  ;;  %v488_v48 = vadd.f32 %v1010_v11, %v1249_v54  ;;  %v616_v1 = vadd.f32 %v1042_v12, %v1249_v54  ;;  %v479_v13 = vpop.f32.mrb[21].mxu0  ;;  %v607_v2 = vpop.f32.mrb[21].mxu1 }
 0x107   :  { %v934_v14 = vpack.c.bf16 %v750_v10, %v750_v10  ;;  %v751_v50 = vmax.f32 %v719_v63, %v735_v0  ;;  %v480_v19 = vadd.f32 %v1249_v54, %v479_v13  ;;  %v608_v5 = vadd.f32 %v1249_v54, %v607_v2  ;;  %v1011_v15 = vpop.f32.mrb[22].mxu0  ;;  %v1043_v62 = vpop.f32.mrb[22].mxu1 }
 0x108   :  { %833 = vst.msk [vmem:[%s1540_s3 + $0x8] sm:$0xf] %vm830_vm3, %v936_v44  ;;  %v937_v6 = vpack.c.bf16 %v753_v47, %v753_v47  ;;  %v676_v16 = vmax.f32 %v488_v48, 0.0  ;;  %v708_v43 = vmax.f32 %v616_v1, 0.0  ;;  %v491_v3 = vadd.f32 %v1011_v15, %v1249_v54  ;;  %v482_v31 = vpop.f32.mrb[23].mxu0  ;;  %v610_v32 = vpop.f32.mrb[23].mxu1 }
 0x109   :  { %831 = vst.msk [vmem:[%s1540_s3] sm:$0xf] %vm830_vm3, %v934_v14  ;;  %v935_v56 = vpack.c.bf16 %v751_v50, %v751_v50  ;;  %v674_v53 = vmax.f32 %v480_v19, 0.0  ;;  %v706_v20 = vmax.f32 %v608_v5, 0.0  ;;  %v619_v55 = vadd.f32 %v1043_v62, %v1249_v54 }
 0x10a   :  { %834 = vst.msk [vmem:[%s1540_s3 + $0xc] sm:$0xf] %vm830_vm3, %v937_v6  ;;  %v724_v51 = vmax.f32 %v660_v21, %v676_v16  ;;  %v740_v4 = vmax.f32 %v692_v22, %v708_v43  ;;  %v677_v26 = vmax.f32 %v491_v3, 0.0  ;;  %v483_v52 = vadd.f32 %v1249_v54, %v482_v31 }
 0x10b   :  { %832 = vst.msk [vmem:[%s1540_s3 + $0x4] sm:$0xf] %vm830_vm3, %v935_v56  ;;  %v722_v59 = vmax.f32 %v658_v39, %v674_v53  ;;  %v738_v60 = vmax.f32 %v690_v40, %v706_v20  ;;  %v709_v10 = vmax.f32 %v619_v55, 0.0  ;;  %v611_v7 = vadd.f32 %v1249_v54, %v610_v32 }
 0x10c   :  { %v756_v21 = vmax.f32 %v724_v51, %v740_v4  ;;  %v1541_v22 = vmax.f32 %v1298_v23, 0.0  ;;  %v675_v0 = vmax.f32 %v483_v52, 0.0  ;;  %v1437_v11 = vadd.f32 %v1249_v54, %v1329_v38 }
 0x10d   :  { %v754_v17 = vmax.f32 %v722_v59, %v738_v60  ;;  %v741_v39 = vmax.f32 %v1542_v18, %v709_v10  ;;  %v707_v40 = vmax.f32 %v611_v7, 0.0  ;;  %v1014_v12 = vpop.f32.mrb[24].mxu0  ;;  %v1046_v44 = vpop.f32.mrb[24].mxu1  ;;  %v1544_v50 = vmax.f32 %v1307_v28, 0.0 }
 0x10e   :  { %v725_v63 = vmax.f32 %v1541_v22, %v677_v26  ;;  %v940_v47 = vpack.c.bf16 %v756_v21, %v756_v21  ;;  %v723_v48 = vmax.f32 %v1543_v37, %v675_v0  ;;  %v504_v1 = vadd.f32 %v1014_v12, %v1249_v54  ;;  %v495_v13 = vpop.f32.mrb[25].mxu0  ;;  %v623_v2 = vpop.f32.mrb[25].mxu1 }
 0x10f   :  { %v632_v23 = vadd.f32 %v1046_v44, %v1249_v54  ;;  %v938_v14 = vpack.c.bf16 %v754_v17, %v754_v17  ;;  %v739_v19 = vmax.f32 %v1544_v50, %v707_v40  ;;  %v496_v24 = vadd.f32 %v1249_v54, %v495_v13  ;;  %v1015_v5 = vpop.f32.mrb[26].mxu0  ;;  %v1047_v15 = vpop.f32.mrb[26].mxu1 }
 0x110   :  { %v757_v38 = vmax.f32 %v725_v63, %v741_v39  ;;  %837 = vst.msk [vmem:[%s1540_s3 + $0x18] sm:$0xf] %vm830_vm3, %v940_v47  ;;  %v680_v27 = vmax.f32 %v504_v1, 0.0  ;;  %v624_v6 = vadd.f32 %v1249_v54, %v623_v2  ;;  %v507_v16 = vadd.f32 %v1015_v5, %v1249_v54  ;;  %v498_v43 = vpop.f32.mrb[27].mxu0  ;;  %v626_v3 = vpop.f32.mrb[27].mxu1 }
 0x111   :  { %v712_v62 = vmax.f32 %v632_v23, 0.0  ;;  %835 = vst.msk [vmem:[%s1540_s3 + $0x10] sm:$0xf] %vm830_vm3, %v938_v14  ;;  %v755_v31 = vmax.f32 %v723_v48, %v739_v19  ;;  %v678_v32 = vmax.f32 %v496_v24, 0.0  ;;  %v635_v56 = vadd.f32 %v1047_v15, %v1249_v54 }
 0x112   :  { %v941_v28 = vpack.c.bf16 %v757_v38, %v757_v38  ;;  %v1545_v53 = vmax.f32 %v1310_v29, 0.0  ;;  %v1546_v55 = vmax.f32 %v1313_v30, 0.0  ;;  %v710_v4 = vmax.f32 %v624_v6, 0.0 }
 0x113   :  { %v681_v26 = vmax.f32 %v507_v16, 0.0  ;;  %v939_v52 = vpack.c.bf16 %v755_v31, %v755_v31  ;;  %v1547_v59 = vmax.f32 %v1316_v33, 0.0  ;;  %v713_v10 = vmax.f32 %v635_v56, 0.0 }
 0x114   :  { %v728_v20 = vmax.f32 %v1545_v53, %v680_v27  ;;  %v744_v51 = vmax.f32 %v1546_v55, %v712_v62  ;;  %838 = vst.msk [vmem:[%s1540_s3 + $0x1c] sm:$0xf] %vm830_vm3, %v941_v28  ;;  %v499_v7 = vadd.f32 %v1249_v54, %v498_v43  ;;  %v1548_v29 = vmax.f32 %v1319_v34, 0.0 }
 0x115   :  { %v726_v60 = vmax.f32 %v1547_v59, %v678_v32  ;;  %v1549_v30 = vmax.f32 %v1322_v35, 0.0  ;;  %v627_v0 = vadd.f32 %v1249_v54, %v626_v3  ;;  %v669_v17 = vmax.f32 %v1368_v57, 0.0  ;;  %836 = vst.msk [vmem:[%s1540_s3 + $0x14] sm:$0xf] %vm830_vm3, %v939_v52  ;;  %v1018_v34 = vpop.f32.mrb[28].mxu0  ;;  %v1050_v12 = vpop.f32.mrb[28].mxu1 }
 0x116   :  { %v760_v21 = vmax.f32 %v728_v20, %v744_v51  ;;  %v742_v22 = vmax.f32 %v1548_v29, %v710_v4  ;;  %v701_v18 = vmax.f32 %v1371_v25, 0.0  ;;  %v1550_v33 = vmax.f32 %v1325_v36, 0.0  ;;  %v511_v48 = vpop.f32.mrb[29].mxu0  ;;  %v639_v57 = vpop.f32.mrb[29].mxu1 }
 0x117   :  { %v729_v63 = vmax.f32 %v1549_v30, %v681_v26  ;;  %v679_v40 = vmax.f32 %v499_v7, 0.0  ;;  %v711_v47 = vmax.f32 %v627_v0, 0.0  ;;  %v520_v37 = vadd.f32 %v1018_v34, %v1249_v54  ;;  %v1019_v36 = vpop.f32.mrb[30].mxu0  ;;  %v1051_v14 = vpop.f32.mrb[30].mxu1 }
 0x118   :  { %v745_v39 = vmax.f32 %v1550_v33, %v713_v10  ;;  %v944_v44 = vpack.c.bf16 %v760_v21, %v760_v21  ;;  %v758_v35 = vmax.f32 %v726_v60, %v742_v22  ;;  %v1551_v25 = vmax.f32 %v1334_v41, 0.0  ;;  %v514_v41 = vpop.f32.mrb[31].mxu0  ;;  %v642_v15 = vpop.f32.mrb[31].mxu1 }
 0x119   :  { %v648_v13 = vadd.f32 %v1050_v12, %v1249_v54  ;;  %v512_v2 = vadd.f32 %v1249_v54, %v511_v48  ;;  %v1552_v50 = vmax.f32 %v1337_v42, 0.0  ;;  %v684_v24 = vmax.f32 %v520_v37, 0.0 }
 0x11a   :  { %v761_v1 = vmax.f32 %v729_v63, %v745_v39  ;;  %v727_v23 = vmax.f32 %v1551_v25, %v679_v40  ;;  %841 = vst.msk [vmem:[%s1540_s3 + $0x28] sm:$0xf] %vm830_vm3, %v944_v44  ;;  %v942_v38 = vpack.c.bf16 %v758_v35, %v758_v35  ;;  %v640_v5 = vadd.f32 %v1249_v54, %v639_v57 }
 0x11b   :  { %v743_v19 = vmax.f32 %v1552_v50, %v711_v47  ;;  %v716_v62 = vmax.f32 %v648_v13, 0.0  ;;  %v682_v6 = vmax.f32 %v512_v2, 0.0  ;;  %v523_v16 = vadd.f32 %v1019_v36, %v1249_v54 }
 0x11c   :  { %v945_v27 = vpack.c.bf16 %v761_v1, %v761_v1  ;;  %839 = vst.msk [vmem:[%s1540_s3 + $0x20] sm:$0xf] %vm830_vm3, %v942_v38  ;;  %v1553_v3 = vmax.f32 %v1342_v45, 0.0  ;;  %v714_v28 = vmax.f32 %v640_v5, 0.0  ;;  %v651_v31 = vadd.f32 %v1051_v14, %v1249_v54 }
 0x11d   :  { %v759_v43 = vmax.f32 %v727_v23, %v743_v19  ;;  %v1554_v32 = vmax.f32 %v1345_v46, 0.0  ;;  %v730_v53 = vmax.f32 %v666_v49, %v682_v6  ;;  %v685_v20 = vmax.f32 %v523_v16, 0.0 }
 0x11e   :  { %v732_v42 = vmax.f32 %v1553_v3, %v684_v24  ;;  %842 = vst.msk [vmem:[%s1540_s3 + $0x2c] sm:$0xf] %vm830_vm3, %v945_v27  ;;  %v515_v55 = vadd.f32 %v1249_v54, %v514_v41  ;;  %v746_v45 = vmax.f32 %v698_v9, %v714_v28  ;;  %v717_v4 = vmax.f32 %v651_v31, 0.0 }
 0x11f   :  { %v748_v56 = vmax.f32 %v1554_v32, %v716_v62  ;;  %v943_v51 = vpack.c.bf16 %v759_v43, %v759_v43  ;;  %v643_v26 = vadd.f32 %v1249_v54, %v642_v15  ;;  %v667_v52 = vmax.f32 %v1431_v8, 0.0 }
 0x120   :  { %v733_v60 = vmax.f32 %v669_v17, %v685_v20  ;;  %v683_v10 = vmax.f32 %v515_v55, 0.0  ;;  %v699_v46 = vmax.f32 %v1437_v11, 0.0  ;;  %v762_v58 = vmax.f32 %v730_v53, %v746_v45 }
 0x121   :  { %v764_v59 = vmax.f32 %v732_v42, %v748_v56  ;;  %840 = vst.msk [vmem:[%s1540_s3 + $0x24] sm:$0xf] %vm830_vm3, %v943_v51  ;;  %v749_v49 = vmax.f32 %v701_v18, %v717_v4  ;;  %v715_v7 = vmax.f32 %v643_v26, 0.0 }
 0x122   :  { %v731_v9 = vmax.f32 %v667_v52, %v683_v10  ;;  %v946_v21 = vpack.c.bf16 %v762_v58, %v762_v58 }
 0x123   :  { %v948_v61 = vpack.c.bf16 %v764_v59, %v764_v59  ;;  %v765_v29 = vmax.f32 %v733_v60, %v749_v49  ;;  %v747_v54 = vmax.f32 %v699_v46, %v715_v7 }
 0x124   :  { %843 = vst.msk [vmem:[%s1540_s3 + $0x30] sm:$0xf] %vm830_vm3, %v946_v21 }
 0x125   :  { %845 = vst.msk [vmem:[%s1540_s3 + $0x38] sm:$0xf] %vm830_vm3, %v948_v61  ;;  %v949_v8 = vpack.c.bf16 %v765_v29, %v765_v29  ;;  %v763_v11 = vmax.f32 %v731_v9, %v747_v54 }
 0x127   :  { %846 = vst.msk [vmem:[%s1540_s3 + $0x3c] sm:$0xf] %vm830_vm3, %v949_v8  ;;  %v947_v22 = vpack.c.bf16 %v763_v11, %v763_v11 }
 0x129   :  { %844 = vst.msk [vmem:[%s1540_s3 + $0x34] sm:$0xf] %vm830_vm3, %v947_v22 }

// kernel: autoencoder_forward.7
= control target key start
LH: loop header
LB: loop body
LE: loop exit
PB: predicated region body
PF: predicated region fallthrough
CT: control target
= control target key end

     0   :  { %vm318_vm0 = vcmask 261120   ;;  %vm581_vm1 = vcmask 519168   ;;  %s1008_s1 = inlined_call_operand.vmem [shape: bf16[288,64], index: 1, kind: input, shape index: {}]   ;;  %s1009_s0 = inlined_call_operand.vmem [shape: bf16[4,32,288], index: 0, kind: input, shape index: {}]   ;;  %s1010_s2 = inlined_call_operand.vmem [shape: f32[1,64], index: 2, kind: input, shape index: {}]   ;;  %s1011_s3 = inlined_call_operand.vmem [shape: bf16[32,64], index: 3, kind: output, shape index: {}]  }
   0x1   :  { %v759_v0 = vld [vmem:[%s1008_s1 + $0x40] sm:$0xff]   ;;  %v761_v2 = vld [vmem:[%s1008_s1 + $0x48] sm:$0xff]   ;;  %v763_v4 = vld [vmem:[%s1008_s1 + $0x50] sm:$0xff]  }
   0x2   :  { %v760_v1 = vld [vmem:[%s1008_s1] sm:$0xff]   ;;  %649 = vmatprep.subr.bf16.mxu0 %v759_v0  ;;  %743 = vmatprep.subr.bf16.mxu1 %v759_v0  ;;  %v762_v3 = vld [vmem:[%s1008_s1 + $0x8] sm:$0xff]   ;;  %v764_v5 = vld [vmem:[%s1008_s1 + $0x10] sm:$0xff]  }
   0x3   :  { %650 = vmatpush3.bf16.msra.mxu0 %v760_v1  ;;  %751 = vmatpush3.bf16.msra.mxu1 %v760_v1  ;;  %v765_v6 = vld [vmem:[%s1008_s1 + $0x58] sm:$0xff]   ;;  %v767_v8 = vld [vmem:[%s1008_s1 + $0x60] sm:$0xff]   ;;  %v769_v10 = vld [vmem:[%s1008_s1 + $0x68] sm:$0xff]  }
   0x4   :  { %651 = vmatprep.subr.bf16.mxu0 %v761_v2  ;;  %744 = vmatprep.subr.bf16.mxu1 %v761_v2  ;;  %v766_v7 = vld [vmem:[%s1008_s1 + $0x18] sm:$0xff]   ;;  %v768_v9 = vld [vmem:[%s1008_s1 + $0x20] sm:$0xff]   ;;  %v770_v13 = vld [vmem:[%s1008_s1 + $0x28] sm:$0xff]  }
   0x5   :  { %v777_v11 = vld [vmem:[%s1009_s0 + $0x4] ss:$12 sps:$4 sm:$0xff]   ;;  %v780_v12 = vld [vmem:[%s1009_s0 + $0x94] ss:$12 sps:$4 sm:$0xff]   ;;  %v773_v16 = vld [vmem:[%s1008_s1 + $0x78] sm:$0xff]  }
   0x6   :  { %v771_v14 = vld [vmem:[%s1008_s1 + $0x70] sm:$0xff]   ;;  %375 = vmatprep.mubr.bf16.mxu0 %v777_v11  ;;  %423 = vmatprep.mubr.bf16.mxu1 %v780_v12  ;;  %v774_v17 = vld [vmem:[%s1008_s1 + $0x38] sm:$0xff]   ;;  %v775_v18 = vld [vmem:[%s1009_s0] ss:$12 sps:$4 sm:$0xff]  }
   0x7   :  { %652 = vmatpush3.bf16.msra.mxu0 %v762_v3  ;;  %752 = vmatpush3.bf16.msra.mxu1 %v762_v3  ;;  %v772_v15 = vld [vmem:[%s1008_s1 + $0x30] sm:$0xff]   ;;  %v781_v19 = vld [vmem:[%s1008_s1 + $0x80] sm:$0xff]   ;;  %v782_v21 = vld [vmem:[%s1009_s0 + $0x1c] ss:$12 sps:$4 sm:$0xff]  }
   0x8   :  { %653 = vmatprep.subr.bf16.mxu0 %v763_v4  ;;  %745 = vmatprep.subr.bf16.mxu1 %v763_v4  ;;  %v778_v20 = vld [vmem:[%s1009_s0 + $0x90] ss:$12 sps:$4 sm:$0xff]   ;;  %v784_v22 = vld [vmem:[%s1009_s0 + $0xac] ss:$12 sps:$4 sm:$0xff]   ;;  %v787_v25 = vld [vmem:[%s1009_s0 + $0xa8] ss:$12 sps:$4 sm:$0xff]  }
   0x9   :  { %v788_v23 = vld [vmem:[%s1008_s1 + $0x88] sm:$0xff]   ;;  %v786_v24 = vld [vmem:[%s1009_s0 + $0x18] ss:$12 sps:$4 sm:$0xff]   ;;  %v789_v26 = vld [vmem:[%s1009_s0 + $0x34] ss:$12 sps:$4 sm:$0xff]  }
   0xa   :  { %v791_v27 = vld [vmem:[%s1009_s0 + $0x8] ss:$12 sps:$4 sm:$0xff]   ;;  %v792_v28 = vld [vmem:[%s1009_s0 + $0x30] ss:$12 sps:$4 sm:$0xff]   ;;  %v793_v29 = vld [vmem:[%s1009_s0 + $0x20] ss:$12 sps:$4 sm:$0xff]  }
   0xb   :  { %654 = vmatpush3.bf16.msra.mxu0 %v764_v5  ;;  %753 = vmatpush3.bf16.msra.mxu1 %v764_v5  ;;  %v794_v30 = vld [vmem:[%s1009_s0 + $0x4c] ss:$12 sps:$4 sm:$0xff]   ;;  %v797_v32 = vld [vmem:[%s1009_s0 + $0x48] ss:$12 sps:$4 sm:$0xff]   ;;  %v798_v33 = vld [vmem:[%s1009_s0 + $0x50] ss:$12 sps:$4 sm:$0xff]  }
   0xc   :  { %655 = vmatprep.subr.bf16.mxu0 %v765_v6  ;;  %746 = vmatprep.subr.bf16.mxu1 %v765_v6  ;;  %v796_v31 = vld [vmem:[%s1009_s0 + $0x38] ss:$12 sps:$4 sm:$0xff]   ;;  %v801_v35 = vld [vmem:[%s1009_s0 + $0x68] ss:$12 sps:$4 sm:$0xff]   ;;  %v802_v36 = vld [vmem:[%s1009_s0 + $0x60] ss:$12 sps:$4 sm:$0xff]  }
   0xd   :  { %v799_v34 = vld [vmem:[%s1009_s0 + $0x64] ss:$12 sps:$4 sm:$0xff]   ;;  %v803_v37 = vld [vmem:[%s1009_s0 + $0x80] ss:$12 sps:$4 sm:$0xff]   ;;  %v804_v38 = vld [vmem:[%s1009_s0 + $0x7c] ss:$12 sps:$4 sm:$0xff]  }
   0xe   :  { %v806_v39 = vld [vmem:[%s1009_s0 + $0x98] ss:$12 sps:$4 sm:$0xff]   ;;  %v808_v41 = vld [vmem:[%s1009_s0 + $0xb0] ss:$12 sps:$4 sm:$0xff]   ;;  %v974_v2 = vld [vmem:[%s1010_s2] ss:$0 sm:$0xff] }
   0xf   :  { %656 = vmatpush3.bf16.msra.mxu0 %v766_v7  ;;  %754 = vmatpush3.bf16.msra.mxu1 %v766_v7  ;;  %v807_v40 = vld [vmem:[%s1009_s0 + $0x78] ss:$12 sps:$4 sm:$0xff]  }
  0x10   :  { %657 = vmatprep.subr.bf16.mxu0 %v767_v8  ;;  %747 = vmatprep.subr.bf16.mxu1 %v767_v8 }
  0x13   :  { %658 = vmatpush3.bf16.msra.mxu0 %v768_v9  ;;  %755 = vmatpush3.bf16.msra.mxu1 %v768_v9 }
  0x14   :  { %659 = vmatprep.subr.bf16.mxu0 %v769_v10  ;;  %748 = vmatprep.subr.bf16.mxu1 %v769_v10 }
  0x17   :  { %660 = vmatpush3.bf16.msra.mxu0 %v770_v13  ;;  %756 = vmatpush3.bf16.msra.mxu1 %v770_v13 }
  0x18   :  { %661 = vmatprep.subr.bf16.mxu0 %v771_v14  ;;  %749 = vmatprep.subr.bf16.mxu1 %v771_v14 }
  0x1b   :  { %662 = vmatpush3.bf16.msra.mxu0 %v772_v15  ;;  %757 = vmatpush3.bf16.msra.mxu1 %v772_v15 }
  0x1c   :  { %663 = vmatprep.subr.bf16.mxu0 %v773_v16  ;;  %750 = vmatprep.subr.bf16.mxu1 %v773_v16 }
  0x1f   :  { %664 = vmatpush3.bf16.msra.mxu0 %v774_v17  ;;  %758 = vmatpush3.bf16.msra.mxu1 %v774_v17 }
  0x20   :  { %723 = vmatprep.subr.bf16.mxu1 %v781_v19 }
  0x22   :  { %376 = vmatmul.mubr.bf16.vlgmr.msra.gmra.mrb[0].mxu0 %v775_v18  ;;  %424 = vmatmul.mubr.bf16.vlgmr.msra.gmra.mrb[0].mxu1 %v778_v20 }
  0x23   :  { %724 = vmatpush3.bf16.msra.mxu1 %v781_v19  ;;  %383 = vmatprep.mubr.bf16.mxu0 %v782_v21 }
  0x24   :  { %431 = vmatprep.mubr.bf16.mxu1 %v784_v22  ;;  %725 = vmatprep.subr.bf16.mxu1 %v788_v23 }
  0x27   :  { %726 = vmatpush3.bf16.msra.mxu1 %v788_v23 }
  0x2a   :  { %384 = vmatmul.mubr.bf16.gmra.mrb[4].mxu0 %v786_v24  ;;  %432 = vmatmul.mubr.bf16.gmra.mrb[4].mxu1 %v787_v25 }
  0x2b   :  { %391 = vmatprep.mubr.bf16.mxu0 %v789_v26  ;;  %727 = vmatprep.mubr.msk.bf16.mxu1 %vm318_vm0, %v791_v27 }
  0x32   :  { %392 = vmatmul.mubr.bf16.gmra.mrb[8].mxu0 %v792_v28  ;;  %728 = vmatmul.mubr.msk.bf16.vlgmr.msra.gmra.mrb[8].mxu1 %vm318_vm0, %v793_v29 }
  0x33   :  { %399 = vmatprep.mubr.bf16.mxu0 %v794_v30  ;;  %731 = vmatprep.mubr.msk.bf16.mxu1 %vm318_vm0, %v796_v31 }
  0x3a   :  { %400 = vmatmul.mubr.bf16.gmra.mrb[12].mxu0 %v797_v32  ;;  %732 = vmatmul.mubr.msk.bf16.gmra.mrb[12].mxu1 %vm318_vm0, %v798_v33 }
  0x3b   :  { %407 = vmatprep.mubr.bf16.mxu0 %v799_v34  ;;  %735 = vmatprep.mubr.msk.bf16.mxu1 %vm318_vm0, %v801_v35 }
  0x42   :  { %408 = vmatmul.mubr.bf16.gmra.mrb[16].mxu0 %v802_v36  ;;  %736 = vmatmul.mubr.msk.bf16.gmra.mrb[16].mxu1 %vm318_vm0, %v803_v37 }
  0x43   :  { %415 = vmatprep.mubr.bf16.mxu0 %v804_v38  ;;  %739 = vmatprep.mubr.msk.bf16.mxu1 %vm318_vm0, %v806_v39 }
  0x4a   :  { %416 = vmatmul.mubr.bf16.gmra.mrb[20].mxu0 %v807_v40  ;;  %740 = vmatmul.mubr.msk.bf16.gmra.mrb[20].mxu1 %vm318_vm0, %v808_v41 }
  0xf5   :  { %v665_v42 = vpop.f32.mrb[0].mxu0  ;;  %v701_v43 = vpop.f32.mrb[0].mxu1 }
  0xf6   :  { %v666_v44 = vpop.f32.mrb[1].mxu0  ;;  %v702_v45 = vpop.f32.mrb[1].mxu1 }
  0xf7   :  { %v667_v46 = vadd.f32 %v666_v44, %v665_v42  ;;  %v668_v47 = vpop.f32.mrb[2].mxu0  ;;  %v963_v48 = vadd.f32 %v702_v45, %v701_v43  ;;  %v704_v49 = vpop.f32.mrb[2].mxu1 }
  0xf8   :  { %v669_v50 = vpop.f32.mrb[3].mxu0  ;;  %v705_v51 = vpop.f32.mrb[3].mxu1 }
  0xf9   :  { %v670_v52 = vadd.f32 %v669_v50, %v668_v47  ;;  %v965_v53 = vadd.f32 %v705_v51, %v704_v49  ;;  %v378_v6 = vadd.f32 %v667_v46, %v974_v2 }
  0xfb   :  { %v381_v15 = vadd.f32 %v670_v52, %v974_v2 }
  0xfd   :  { %v671_v54 = vpop.f32.mrb[4].mxu0  ;;  %v707_v55 = vpop.f32.mrb[4].mxu1 }
  0xfe   :  { %v672_v56 = vpop.f32.mrb[5].mxu0  ;;  %v708_v57 = vpop.f32.mrb[5].mxu1 }
  0xff   :  { %v673_v58 = vadd.f32 %v672_v56, %v671_v54  ;;  %v674_v59 = vpop.f32.mrb[6].mxu0  ;;  %v967_v60 = vadd.f32 %v708_v57, %v707_v55  ;;  %v710_v61 = vpop.f32.mrb[6].mxu1 }
 0x100   :  { %v675_v62 = vpop.f32.mrb[7].mxu0  ;;  %v711_v63 = vpop.f32.mrb[7].mxu1 }
 0x101   :  { %v676_v0 = vadd.f32 %v675_v62, %v674_v59  ;;  %v969_v1 = vadd.f32 %v711_v63, %v710_v61  ;;  %v386_v3 = vadd.f32 %v673_v58, %v974_v2 }
 0x103   :  { %v389_v10 = vadd.f32 %v676_v0, %v974_v2 }
 0x105   :  { %v677_v4 = vpop.f32.mrb[8].mxu0  ;;  %v729_v5 = vpop.f32.mrb[8].mxu1 }
 0x106   :  { %v483_v7 = vadd.f32 %v729_v5, %v386_v3  ;;  %v678_v8 = vpop.f32.mrb[9].mxu0  ;;  %v474_v9 = vpop.f32.mrb[9].mxu1  ;;  %v434_v5 = vadd.f32 %v967_v60, %v974_v2 }
 0x107   :  { %v679_v11 = vadd.f32 %v678_v8, %v677_v4  ;;  %v475_v12 = vadd.f32 %v474_v9, %v378_v6  ;;  %v680_v13 = vpop.f32.mrb[10].mxu0  ;;  %v730_v14 = vpop.f32.mrb[10].mxu1  ;;  %v426_v9 = vadd.f32 %v963_v48, %v974_v2 }
 0x108   :  { %v486_v16 = vadd.f32 %v730_v14, %v389_v10  ;;  %v681_v17 = vpop.f32.mrb[11].mxu0  ;;  %v477_v18 = vpop.f32.mrb[11].mxu1  ;;  %v539_v43 = vmax.f32 %v483_v7, 0.0 }
 0x109   :  { %v682_v19 = vadd.f32 %v681_v17, %v680_v13  ;;  %v478_v20 = vadd.f32 %v477_v18, %v381_v15  ;;  %v394_v23 = vadd.f32 %v679_v11, %v974_v2  ;;  %v537_v31 = vmax.f32 %v475_v12, 0.0 }
 0x10a   :  { %v540_v52 = vmax.f32 %v486_v16, 0.0  ;;  %v437_v13 = vadd.f32 %v969_v1, %v974_v2  ;;  %v429_v18 = vadd.f32 %v965_v53, %v974_v2 }
 0x10b   :  { %v397_v30 = vadd.f32 %v682_v19, %v974_v2  ;;  %v538_v38 = vmax.f32 %v478_v20, 0.0 }
 0x10d   :  { %v683_v21 = vpop.f32.mrb[12].mxu0  ;;  %v733_v22 = vpop.f32.mrb[12].mxu1 }
 0x10e   :  { %v684_v24 = vpop.f32.mrb[13].mxu0  ;;  %v490_v25 = vpop.f32.mrb[13].mxu1 }
 0x10f   :  { %v685_v26 = vadd.f32 %v684_v24, %v683_v21  ;;  %v491_v27 = vadd.f32 %v490_v25, %v394_v23  ;;  %v686_v28 = vpop.f32.mrb[14].mxu0  ;;  %v734_v29 = vpop.f32.mrb[14].mxu1 }
 0x110   :  { %v687_v32 = vpop.f32.mrb[15].mxu0  ;;  %v493_v33 = vpop.f32.mrb[15].mxu1 }
 0x111   :  { %v402_v34 = vadd.f32 %v685_v26, %v974_v2  ;;  %v541_v35 = vmax.f32 %v491_v27, 0.0  ;;  %v688_v36 = vadd.f32 %v687_v32, %v686_v28  ;;  %v494_v37 = vadd.f32 %v493_v33, %v397_v30 }
 0x113   :  { %v499_v39 = vadd.f32 %v733_v22, %v402_v34  ;;  %v553_v40 = vmax.f32 %v537_v31, %v541_v35  ;;  %v405_v41 = vadd.f32 %v688_v36, %v974_v2  ;;  %v542_v42 = vmax.f32 %v494_v37, 0.0 }
 0x115   :  { %v543_v44 = vmax.f32 %v499_v39, 0.0  ;;  %v502_v45 = vadd.f32 %v734_v29, %v405_v41  ;;  %v554_v46 = vmax.f32 %v538_v38, %v542_v42  ;;  %v689_v47 = vpop.f32.mrb[16].mxu0  ;;  %v737_v49 = vpop.f32.mrb[16].mxu1 }
 0x116   :  { %v690_v50 = vpop.f32.mrb[17].mxu0  ;;  %v506_v51 = vpop.f32.mrb[17].mxu1 }
 0x117   :  { %v555_v54 = vmax.f32 %v539_v43, %v543_v44  ;;  %v544_v55 = vmax.f32 %v502_v45, 0.0  ;;  %v691_v56 = vadd.f32 %v690_v50, %v689_v47  ;;  %v692_v57 = vpop.f32.mrb[18].mxu0  ;;  %v738_v58 = vpop.f32.mrb[18].mxu1 }
 0x118   :  { %v693_v59 = vpop.f32.mrb[19].mxu0  ;;  %v509_v61 = vpop.f32.mrb[19].mxu1 }
 0x119   :  { %v556_v62 = vmax.f32 %v540_v52, %v544_v55  ;;  %v410_v63 = vadd.f32 %v691_v56, %v974_v2  ;;  %v694_v0 = vadd.f32 %v693_v59, %v692_v57 }
 0x11b   :  { %v507_v3 = vadd.f32 %v506_v51, %v410_v63  ;;  %v413_v4 = vadd.f32 %v694_v0, %v974_v2 }
 0x11d   :  { %v510_v6 = vadd.f32 %v509_v61, %v413_v4  ;;  %v695_v7 = vpop.f32.mrb[20].mxu0  ;;  %v741_v8 = vpop.f32.mrb[20].mxu1  ;;  %v545_v60 = vmax.f32 %v507_v3, 0.0 }
 0x11e   :  { %v531_v10 = vadd.f32 %v741_v8, %v434_v5  ;;  %v696_v11 = vpop.f32.mrb[21].mxu0  ;;  %v522_v12 = vpop.f32.mrb[21].mxu1 }
 0x11f   :  { %v697_v14 = vadd.f32 %v696_v11, %v695_v7  ;;  %v523_v15 = vadd.f32 %v522_v12, %v426_v9  ;;  %v698_v16 = vpop.f32.mrb[22].mxu0  ;;  %v742_v17 = vpop.f32.mrb[22].mxu1  ;;  %v546_v25 = vmax.f32 %v510_v6, 0.0 }
 0x120   :  { %v534_v19 = vadd.f32 %v742_v17, %v437_v13  ;;  %v699_v20 = vpop.f32.mrb[23].mxu0  ;;  %v525_v21 = vpop.f32.mrb[23].mxu1  ;;  %v551_v29 = vmax.f32 %v531_v10, 0.0 }
 0x121   :  { %v418_v22 = vadd.f32 %v697_v14, %v974_v2  ;;  %v549_v48 = vmax.f32 %v523_v15, 0.0  ;;  %v700_v23 = vadd.f32 %v699_v20, %v698_v16  ;;  %v526_v24 = vadd.f32 %v525_v21, %v429_v18 }
 0x122   :  { %v552_v33 = vmax.f32 %v534_v19, 0.0 }
 0x123   :  { %v515_v26 = vadd.f32 %v737_v49, %v418_v22  ;;  %v557_v27 = vmax.f32 %v545_v60, %v549_v48  ;;  %v421_v1 = vadd.f32 %v700_v23, %v974_v2  ;;  %v550_v28 = vmax.f32 %v526_v24, 0.0 }
 0x125   :  { %v547_v30 = vmax.f32 %v515_v26, 0.0  ;;  %v561_v31 = vmax.f32 %v553_v40, %v557_v27  ;;  %v518_v32 = vadd.f32 %v738_v58, %v421_v1  ;;  %v558_v53 = vmax.f32 %v546_v25, %v550_v28 }
 0x127   :  { %v559_v34 = vmax.f32 %v547_v30, %v551_v29  ;;  %v645_v35 = vpack.c.bf16 %v561_v31, %v561_v31  ;;  %v548_v36 = vmax.f32 %v518_v32, 0.0  ;;  %v562_v37 = vmax.f32 %v554_v46, %v558_v53 }
 0x129   :  { %v563_v38 = vmax.f32 %v555_v54, %v559_v34  ;;  %582 = vst.msk [vmem:[%s1011_s3] sm:$0xf] %vm581_vm1, %v645_v35  ;;  %v560_v39 = vmax.f32 %v548_v36, %v552_v33  ;;  %v646_v41 = vpack.c.bf16 %v562_v37, %v562_v37 }
 0x12b   :  { %v647_v2 = vpack.c.bf16 %v563_v38, %v563_v38  ;;  %v564_v42 = vmax.f32 %v556_v62, %v560_v39  ;;  %583 = vst.msk [vmem:[%s1011_s3 + $0x4] sm:$0xf] %vm581_vm1, %v646_v41 }
 0x12d   :  { %584 = vst.msk [vmem:[%s1011_s3 + $0x8] sm:$0xf] %vm581_vm1, %v647_v2  ;;  %v648_v40 = vpack.c.bf16 %v564_v42, %v564_v42 }
 0x12f   :  { %585 = vst.msk [vmem:[%s1011_s3 + $0xc] sm:$0xf] %vm581_vm1, %v648_v40 }

// kernel: autoencoder_forward.8
= control target key start
LH: loop header
LB: loop body
LE: loop exit
PB: predicated region body
PF: predicated region fallthrough
CT: control target
= control target key end

     0   :  { %vm434_vm0 = vcmask 523264   ;;  %s1113_s1 = inlined_call_operand.vmem [shape: bf16[576,128], index: 1, kind: input, shape index: {}]   ;;  %s1114_s0 = inlined_call_operand.vmem [shape: bf16[4,16,576], index: 0, kind: input, shape index: {}]   ;;  %s1115_s2 = inlined_call_operand.vmem [shape: f32[1,128], index: 2, kind: input, shape index: {}]   ;;  %s1116_s3 = inlined_call_operand.vmem [shape: bf16[16,128], index: 3, kind: output, shape index: {}]  }
   0x1   :  { %v852_v0 = vld [vmem:[%s1113_s1 + $0x40] sm:$0xff]   ;;  %v856_v4 = vld [vmem:[%s1113_s1 + $0x48] sm:$0xff]   ;;  %v860_v8 = vld [vmem:[%s1113_s1 + $0x50] sm:$0xff]  }
   0x2   :  { %v853_v1 = vld [vmem:[%s1113_s1 + $0xc0] sm:$0xff]   ;;  %740 = vmatprep.subr.bf16.mxu0 %v852_v0  ;;  %v857_v5 = vld [vmem:[%s1113_s1 + $0xc8] sm:$0xff]   ;;  %v861_v9 = vld [vmem:[%s1113_s1 + $0xd0] sm:$0xff]  }
   0x3   :  { %v854_v2 = vld [vmem:[%s1113_s1] sm:$0xff]   ;;  %780 = vmatprep.subr.bf16.mxu1 %v853_v1  ;;  %v858_v6 = vld [vmem:[%s1113_s1 + $0x8] sm:$0xff]   ;;  %v862_v10 = vld [vmem:[%s1113_s1 + $0x10] sm:$0xff]  }
   0x4   :  { %v855_v3 = vld [vmem:[%s1113_s1 + $0x80] sm:$0xff]   ;;  %741 = vmatpush3.bf16.msra.mxu0 %v854_v2  ;;  %v859_v7 = vld [vmem:[%s1113_s1 + $0x88] sm:$0xff]   ;;  %v863_v11 = vld [vmem:[%s1113_s1 + $0x90] sm:$0xff]  }
   0x5   :  { %781 = vmatpush3.bf16.msra.mxu1 %v855_v3  ;;  %742 = vmatprep.subr.bf16.mxu0 %v856_v4  ;;  %v864_v12 = vld [vmem:[%s1113_s1 + $0x58] sm:$0xff]   ;;  %v868_v16 = vld [vmem:[%s1113_s1 + $0x60] sm:$0xff]   ;;  %v872_v20 = vld [vmem:[%s1113_s1 + $0x68] sm:$0xff]  }
   0x6   :  { %782 = vmatprep.subr.bf16.mxu1 %v857_v5  ;;  %v865_v13 = vld [vmem:[%s1113_s1 + $0xd8] sm:$0xff]   ;;  %v869_v17 = vld [vmem:[%s1113_s1 + $0xe0] sm:$0xff]   ;;  %v873_v21 = vld [vmem:[%s1113_s1 + $0xe8] sm:$0xff]  }
   0x7   :  { %v866_v14 = vld [vmem:[%s1113_s1 + $0x18] sm:$0xff]   ;;  %v870_v18 = vld [vmem:[%s1113_s1 + $0x20] sm:$0xff]   ;;  %v874_v22 = vld [vmem:[%s1113_s1 + $0x28] sm:$0xff]  }
   0x8   :  { %743 = vmatpush3.bf16.msra.mxu0 %v858_v6  ;;  %v867_v15 = vld [vmem:[%s1113_s1 + $0x98] sm:$0xff]   ;;  %v871_v19 = vld [vmem:[%s1113_s1 + $0xa0] sm:$0xff]   ;;  %v875_v23 = vld [vmem:[%s1113_s1 + $0xa8] sm:$0xff]  }
   0x9   :  { %783 = vmatpush3.bf16.msra.mxu1 %v859_v7  ;;  %744 = vmatprep.subr.bf16.mxu0 %v860_v8  ;;  %v876_v24 = vld [vmem:[%s1113_s1 + $0x70] sm:$0xff]   ;;  %v880_v28 = vld [vmem:[%s1113_s1 + $0x78] sm:$0xff]   ;;  %v889_v35 = vld [vmem:[%s1114_s0 + $0xc] ss:$20 sps:$4 sm:$0xff]  }
   0xa   :  { %784 = vmatprep.subr.bf16.mxu1 %v861_v9  ;;  %v877_v25 = vld [vmem:[%s1113_s1 + $0xf0] sm:$0xff]   ;;  %v881_v29 = vld [vmem:[%s1113_s1 + $0xf8] sm:$0xff]   ;;  %v890_v36 = vld [vmem:[%s1113_s1 + $0x100] sm:$0xff]   ;;  %544 = vmatprep.mubr.bf16.mxu1 %v889_v35 }
   0xb   :  { %v878_v26 = vld [vmem:[%s1113_s1 + $0x30] sm:$0xff]   ;;  %v882_v30 = vld [vmem:[%s1113_s1 + $0x38] sm:$0xff]   ;;  %v891_v37 = vld [vmem:[%s1114_s0 + $0x2c] ss:$20 sps:$4 sm:$0xff]  }
   0xc   :  { %745 = vmatpush3.bf16.msra.mxu0 %v862_v10  ;;  %v879_v27 = vld [vmem:[%s1113_s1 + $0xb0] sm:$0xff]   ;;  %v883_v31 = vld [vmem:[%s1113_s1 + $0xb8] sm:$0xff]   ;;  %v897_v39 = vld [vmem:[%s1113_s1 + $0x108] sm:$0xff]  }
   0xd   :  { %785 = vmatpush3.bf16.msra.mxu1 %v863_v11  ;;  %746 = vmatprep.subr.bf16.mxu0 %v864_v12  ;;  %v884_v32 = vld [vmem:[%s1114_s0] ss:$20 sps:$4 sm:$0xff]   ;;  %v886_v33 = vld [vmem:[%s1114_s0 + $0x4] ss:$20 sps:$4 sm:$0xff]   ;;  %v887_v34 = vld [vmem:[%s1114_s0 + $0x8] ss:$20 sps:$4 sm:$0xff]  }
   0xe   :  { %786 = vmatprep.subr.bf16.mxu1 %v865_v13  ;;  %479 = vmatprep.mubr.bf16.mxu0 %v886_v33  ;;  %v893_v38 = vld [vmem:[%s1114_s0 + $0x34] ss:$20 sps:$4 sm:$0xff]   ;;  %v896_v41 = vld [vmem:[%s1114_s0 + $0x30] ss:$20 sps:$4 sm:$0xff]   ;;  %v911_v45 = vld [vmem:[%s1113_s1 + $0x118] sm:$0xff]  }
   0xf   :  { %v895_v40 = vld [vmem:[%s1114_s0 + $0x28] ss:$20 sps:$4 sm:$0xff]   ;;  %v904_v44 = vld [vmem:[%s1113_s1 + $0x110] sm:$0xff]   ;;  %v903_v47 = vld [vmem:[%s1114_s0 + $0x58] ss:$20 sps:$4 sm:$0xff]  }
  0x10   :  { %747 = vmatpush3.bf16.msra.mxu0 %v866_v14  ;;  %v898_v42 = vld [vmem:[%s1114_s0 + $0x54] ss:$20 sps:$4 sm:$0xff]   ;;  %v900_v43 = vld [vmem:[%s1114_s0 + $0x5c] ss:$20 sps:$4 sm:$0xff]   ;;  %v907_v49 = vld [vmem:[%s1114_s0 + $0x84] ss:$20 sps:$4 sm:$0xff]  }
  0x11   :  { %787 = vmatpush3.bf16.msra.mxu1 %v867_v15  ;;  %748 = vmatprep.subr.bf16.mxu0 %v868_v16  ;;  %v902_v46 = vld [vmem:[%s1114_s0 + $0x50] ss:$20 sps:$4 sm:$0xff]   ;;  %v909_v50 = vld [vmem:[%s1114_s0 + $0x78] ss:$20 sps:$4 sm:$0xff]   ;;  %v910_v51 = vld [vmem:[%s1114_s0 + $0x80] ss:$20 sps:$4 sm:$0xff]  }
  0x12   :  { %788 = vmatprep.subr.bf16.mxu1 %v869_v17  ;;  %v905_v48 = vld [vmem:[%s1114_s0 + $0x7c] ss:$20 sps:$4 sm:$0xff]   ;;  %v913_v53 = vld [vmem:[%s1114_s0 + $0x60] ss:$20 sps:$4 sm:$0xff]   ;;  %v914_v54 = vld [vmem:[%s1114_s0 + $0x38] ss:$20 sps:$4 sm:$0xff]  }
  0x13   :  { %v912_v52 = vld [vmem:[%s1114_s0 + $0x10] ss:$20 sps:$4 sm:$0xff]   ;;  %v915_v55 = vld [vmem:[%s1114_s0 + $0x88] ss:$20 sps:$4 sm:$0xff]   ;;  %v670_v58 = vld [vmem:[%s1115_s2] ss:$0 sm:$0xff] }
  0x14   :  { %749 = vmatpush3.bf16.msra.mxu0 %v870_v18 }
  0x15   :  { %789 = vmatpush3.bf16.msra.mxu1 %v871_v19  ;;  %750 = vmatprep.subr.bf16.mxu0 %v872_v20 }
  0x16   :  { %790 = vmatprep.subr.bf16.mxu1 %v873_v21 }
  0x18   :  { %751 = vmatpush3.bf16.msra.mxu0 %v874_v22 }
  0x19   :  { %791 = vmatpush3.bf16.msra.mxu1 %v875_v23  ;;  %752 = vmatprep.subr.bf16.mxu0 %v876_v24 }
  0x1a   :  { %792 = vmatprep.subr.bf16.mxu1 %v877_v25 }
  0x1c   :  { %753 = vmatpush3.bf16.msra.mxu0 %v878_v26 }
  0x1d   :  { %793 = vmatpush3.bf16.msra.mxu1 %v879_v27  ;;  %754 = vmatprep.subr.bf16.mxu0 %v880_v28 }
  0x1e   :  { %794 = vmatprep.subr.bf16.mxu1 %v881_v29 }
  0x20   :  { %755 = vmatpush3.bf16.msra.mxu0 %v882_v30 }
  0x21   :  { %795 = vmatpush3.bf16.msra.mxu1 %v883_v31  ;;  %828 = vmatprep.subr.bf16.mxu0 %v890_v36 }
  0x22   :  { %844 = vmatprep.subr.bf16.mxu1 %v890_v36 }
  0x23   :  { %480 = vmatmul.mubr.bf16.vlgmr.msra.gmra.mrb[0].mxu0 %v884_v32 }
  0x24   :  { %545 = vmatmul.mubr.bf16.vlgmr.msra.gmra.mrb[0].mxu1 %v887_v34  ;;  %829 = vmatpush3.bf16.msra.mxu0 %v890_v36 }
  0x25   :  { %848 = vmatpush3.bf16.msra.mxu1 %v890_v36  ;;  %487 = vmatprep.mubr.bf16.mxu0 %v891_v37 }
  0x26   :  { %552 = vmatprep.mubr.bf16.mxu1 %v893_v38  ;;  %830 = vmatprep.subr.bf16.mxu0 %v897_v39 }
  0x27   :  { %845 = vmatprep.subr.bf16.mxu1 %v897_v39 }
  0x28   :  { %831 = vmatpush3.bf16.msra.mxu0 %v897_v39 }
  0x29   :  { %849 = vmatpush3.bf16.msra.mxu1 %v897_v39  ;;  %832 = vmatprep.subr.bf16.mxu0 %v904_v44 }
  0x2a   :  { %846 = vmatprep.subr.bf16.mxu1 %v904_v44 }
  0x2b   :  { %488 = vmatmul.mubr.bf16.gmra.mrb[4].mxu0 %v895_v40 }
  0x2c   :  { %553 = vmatmul.mubr.bf16.gmra.mrb[4].mxu1 %v896_v41  ;;  %495 = vmatprep.mubr.bf16.mxu0 %v898_v42 }
  0x2d   :  { %560 = vmatprep.mubr.bf16.mxu1 %v900_v43  ;;  %833 = vmatpush3.bf16.msra.mxu0 %v904_v44 }
  0x2e   :  { %850 = vmatpush3.bf16.msra.mxu1 %v904_v44  ;;  %834 = vmatprep.subr.bf16.mxu0 %v911_v45 }
  0x2f   :  { %847 = vmatprep.subr.bf16.mxu1 %v911_v45 }
  0x31   :  { %835 = vmatpush3.bf16.msra.mxu0 %v911_v45 }
  0x32   :  { %851 = vmatpush3.bf16.msra.mxu1 %v911_v45 }
  0x33   :  { %496 = vmatmul.mubr.bf16.gmra.mrb[8].mxu0 %v902_v46 }
  0x34   :  { %561 = vmatmul.mubr.bf16.gmra.mrb[8].mxu1 %v903_v47  ;;  %503 = vmatprep.mubr.bf16.mxu0 %v905_v48 }
  0x35   :  { %568 = vmatprep.mubr.bf16.mxu1 %v907_v49 }
  0x3b   :  { %504 = vmatmul.mubr.bf16.gmra.mrb[12].mxu0 %v909_v50 }
  0x3c   :  { %569 = vmatmul.mubr.bf16.gmra.mrb[12].mxu1 %v910_v51  ;;  %836 = vmatprep.mubr.msk.bf16.mxu0 %vm434_vm0, %v912_v52 }
  0x3d   :  { %840 = vmatprep.mubr.msk.bf16.mxu1 %vm434_vm0, %v913_v53 }
  0x43   :  { %837 = vmatmul.mubr.msk.bf16.vlgmr.msra.gmra.mrb[16].mxu0 %vm434_vm0, %v914_v54 }
  0x44   :  { %841 = vmatmul.mubr.msk.bf16.vlgmr.msra.gmra.mrb[16].mxu1 %vm434_vm0, %v915_v55 }
  0xf6   :  { %v756_v56 = vpop.f32.mrb[0].mxu0 }
  0xf7   :  { %v796_v57 = vpop.f32.mrb[0].mxu1  ;;  %v757_v59 = vpop.f32.mrb[1].mxu0 }
  0xf8   :  { %v758_v60 = vadd.f32 %v757_v59, %v756_v56  ;;  %v797_v61 = vpop.f32.mrb[1].mxu1  ;;  %v759_v62 = vpop.f32.mrb[2].mxu0 }
  0xf9   :  { %v798_v63 = vadd.f32 %v797_v61, %v796_v57  ;;  %v799_v0 = vpop.f32.mrb[2].mxu1  ;;  %v760_v1 = vpop.f32.mrb[3].mxu0 }
  0xfa   :  { %v482_v2 = vadd.f32 %v758_v60, %v670_v58  ;;  %v761_v3 = vadd.f32 %v760_v1, %v759_v62  ;;  %v800_v4 = vpop.f32.mrb[3].mxu1 }
  0xfb   :  { %v801_v5 = vadd.f32 %v800_v4, %v799_v0 }
  0xfc   :  { %v485_v6 = vadd.f32 %v761_v3, %v670_v58  ;;  %v547_v7 = vadd.f32 %v798_v63, %v482_v2 }
  0xfe   :  { %v762_v8 = vpop.f32.mrb[4].mxu0  ;;  %v1107_v9 = vadd.f32 %v801_v5, %v485_v6 }
  0xff   :  { %v802_v10 = vpop.f32.mrb[4].mxu1  ;;  %v763_v11 = vpop.f32.mrb[5].mxu0 }
 0x100   :  { %v764_v12 = vadd.f32 %v763_v11, %v762_v8  ;;  %v803_v13 = vpop.f32.mrb[5].mxu1  ;;  %v765_v14 = vpop.f32.mrb[6].mxu0 }
 0x101   :  { %v804_v15 = vadd.f32 %v803_v13, %v802_v10  ;;  %v805_v16 = vpop.f32.mrb[6].mxu1  ;;  %v766_v17 = vpop.f32.mrb[7].mxu0 }
 0x102   :  { %v490_v18 = vadd.f32 %v764_v12, %v670_v58  ;;  %v767_v19 = vadd.f32 %v766_v17, %v765_v14  ;;  %v806_v20 = vpop.f32.mrb[7].mxu1 }
 0x103   :  { %v807_v21 = vadd.f32 %v806_v20, %v805_v16 }
 0x104   :  { %v493_v22 = vadd.f32 %v767_v19, %v670_v58  ;;  %v555_v23 = vadd.f32 %v804_v15, %v490_v18 }
 0x106   :  { %v768_v24 = vpop.f32.mrb[8].mxu0  ;;  %v558_v25 = vadd.f32 %v807_v21, %v493_v22 }
 0x107   :  { %v808_v26 = vpop.f32.mrb[8].mxu1  ;;  %v769_v27 = vpop.f32.mrb[9].mxu0 }
 0x108   :  { %v770_v28 = vadd.f32 %v769_v27, %v768_v24  ;;  %v809_v29 = vpop.f32.mrb[9].mxu1  ;;  %v771_v30 = vpop.f32.mrb[10].mxu0 }
 0x109   :  { %v810_v31 = vadd.f32 %v809_v29, %v808_v26  ;;  %v811_v32 = vpop.f32.mrb[10].mxu1  ;;  %v772_v33 = vpop.f32.mrb[11].mxu0 }
 0x10a   :  { %v498_v34 = vadd.f32 %v770_v28, %v670_v58  ;;  %v773_v35 = vadd.f32 %v772_v33, %v771_v30  ;;  %v812_v36 = vpop.f32.mrb[11].mxu1 }
 0x10b   :  { %v813_v37 = vadd.f32 %v812_v36, %v811_v32 }
 0x10c   :  { %v501_v38 = vadd.f32 %v773_v35, %v670_v58  ;;  %v563_v39 = vadd.f32 %v810_v31, %v498_v34 }
 0x10e   :  { %v774_v40 = vpop.f32.mrb[12].mxu0  ;;  %v566_v41 = vadd.f32 %v813_v37, %v501_v38 }
 0x10f   :  { %v814_v42 = vpop.f32.mrb[12].mxu1  ;;  %v775_v43 = vpop.f32.mrb[13].mxu0 }
 0x110   :  { %v776_v44 = vadd.f32 %v775_v43, %v774_v40  ;;  %v815_v45 = vpop.f32.mrb[13].mxu1  ;;  %v777_v46 = vpop.f32.mrb[14].mxu0 }
 0x111   :  { %v816_v47 = vadd.f32 %v815_v45, %v814_v42  ;;  %v817_v48 = vpop.f32.mrb[14].mxu1  ;;  %v778_v49 = vpop.f32.mrb[15].mxu0 }
 0x112   :  { %v506_v50 = vadd.f32 %v776_v44, %v670_v58  ;;  %v779_v51 = vadd.f32 %v778_v49, %v777_v46  ;;  %v818_v52 = vpop.f32.mrb[15].mxu1 }
 0x113   :  { %v819_v53 = vadd.f32 %v818_v52, %v817_v48 }
 0x114   :  { %v509_v54 = vadd.f32 %v779_v51, %v670_v58  ;;  %v571_v55 = vadd.f32 %v816_v47, %v506_v50 }
 0x116   :  { %v838_v56 = vpop.f32.mrb[16].mxu0  ;;  %v574_v57 = vadd.f32 %v819_v53, %v509_v54 }
 0x117   :  { %v620_v59 = vadd.f32 %v838_v56, %v555_v23  ;;  %v842_v60 = vpop.f32.mrb[16].mxu1  ;;  %v611_v61 = vpop.f32.mrb[17].mxu0 }
 0x118   :  { %v636_v62 = vadd.f32 %v842_v60, %v571_v55  ;;  %v612_v63 = vadd.f32 %v611_v61, %v547_v7  ;;  %v627_v0 = vpop.f32.mrb[17].mxu1  ;;  %v839_v1 = vpop.f32.mrb[18].mxu0 }
 0x119   :  { %v644_v2 = vmax.f32 %v620_v59, 0.0  ;;  %v628_v3 = vadd.f32 %v627_v0, %v563_v39  ;;  %v623_v4 = vadd.f32 %v839_v1, %v558_v25  ;;  %v843_v5 = vpop.f32.mrb[18].mxu1  ;;  %v614_v6 = vpop.f32.mrb[19].mxu0 }
 0x11a   :  { %v648_v8 = vmax.f32 %v636_v62, 0.0  ;;  %v642_v10 = vmax.f32 %v612_v63, 0.0  ;;  %v639_v11 = vadd.f32 %v843_v5, %v574_v57  ;;  %v615_v58 = vadd.f32 %v614_v6, %v1107_v9  ;;  %v630_v12 = vpop.f32.mrb[19].mxu1 }
 0x11b   :  { %v646_v13 = vmax.f32 %v628_v3, 0.0  ;;  %v645_v14 = vmax.f32 %v623_v4, 0.0  ;;  %v631_v15 = vadd.f32 %v630_v12, %v566_v41 }
 0x11c   :  { %v650_v16 = vmax.f32 %v642_v10, %v644_v2  ;;  %v649_v17 = vmax.f32 %v639_v11, 0.0  ;;  %v643_v18 = vmax.f32 %v615_v58, 0.0 }
 0x11d   :  { %v652_v7 = vmax.f32 %v646_v13, %v648_v8  ;;  %v647_v19 = vmax.f32 %v631_v15, 0.0 }
 0x11e   :  { %v651_v20 = vmax.f32 %v643_v18, %v645_v14 }
 0x11f   :  { %v654_v21 = vmax.f32 %v650_v16, %v652_v7  ;;  %v653_v22 = vmax.f32 %v647_v19, %v649_v17 }
 0x121   :  { %v655_v23 = vmax.f32 %v651_v20, %v653_v22 }
 0x123   :  { %v738_v24 = vpack.c.bf16 %v655_v23, %v654_v21 }
 0x125   :  { %739 = vst [vmem:[%s1116_s3] sm:$0xff] %v738_v24  }

// kernel: autoencoder_forward.9
= control target key start
LH: loop header
LB: loop body
LE: loop exit
PB: predicated region body
PF: predicated region fallthrough
CT: control target
= control target key end

     0   :  { %s957_s1 = inlined_call_operand.vmem [shape: bf16[512,256], index: 1, kind: input, shape index: {}]   ;;  %s958_s0 = inlined_call_operand.vmem [shape: bf16[16,512], index: 0, kind: input, shape index: {}]   ;;  %s959_s2 = inlined_call_operand.vmem [shape: f32[1,256], index: 2, kind: input, shape index: {}]   ;;  %s960_s3 = inlined_call_operand.vmem [shape: bf16[16,256], index: 3, kind: output, shape index: {}]  }
   0x1   :  { %v622_v0 = vld [vmem:[%s957_s1 + $0x4] ss:$8 sps:$4 sm:$0xff]   ;;  %v626_v2 = vld [vmem:[%s957_s1] ss:$8 sps:$4 sm:$0xff]   ;;  %v628_v4 = vld [vmem:[%s957_s1 + $0x14] ss:$8 sps:$4 sm:$0xff]  }
   0x2   :  { %v624_v1 = vld [vmem:[%s957_s1 + $0x104] ss:$8 sps:$4 sm:$0xff]   ;;  %434 = vmatprep.subr.bf16.mxu1 %v622_v0  ;;  %v627_v3 = vld [vmem:[%s957_s1 + $0x100] ss:$8 sps:$4 sm:$0xff]   ;;  %v630_v5 = vld [vmem:[%s957_s1 + $0x114] ss:$8 sps:$4 sm:$0xff]  }
   0x3   :  { %477 = vmatprep.subr.bf16.mxu0 %v624_v1  ;;  %435 = vmatpush1.bf16.msra.mxu1 %v626_v2  ;;  %v632_v6 = vld [vmem:[%s957_s1 + $0x10] ss:$8 sps:$4 sm:$0xff]   ;;  %v634_v8 = vld [vmem:[%s957_s1 + $0x24] ss:$8 sps:$4 sm:$0xff]   ;;  %v638_v10 = vld [vmem:[%s957_s1 + $0x20] ss:$8 sps:$4 sm:$0xff]  }
   0x4   :  { %478 = vmatpush1.bf16.msra.mxu0 %v627_v3  ;;  %436 = vmatprep.subr.bf16.mxu1 %v628_v4  ;;  %v633_v7 = vld [vmem:[%s957_s1 + $0x110] ss:$8 sps:$4 sm:$0xff]   ;;  %v636_v9 = vld [vmem:[%s957_s1 + $0x124] ss:$8 sps:$4 sm:$0xff]   ;;  %v639_v11 = vld [vmem:[%s957_s1 + $0x120] ss:$8 sps:$4 sm:$0xff]   ;;  %v84_v4 = vlaneseq }
   0x5   :  { %479 = vmatprep.subr.bf16.mxu0 %v630_v5  ;;  %v640_v12 = vld [vmem:[%s957_s1 + $0x34] ss:$8 sps:$4 sm:$0xff]   ;;  %v644_v14 = vld [vmem:[%s957_s1 + $0x30] ss:$8 sps:$4 sm:$0xff]   ;;  %v646_v16 = vld [vmem:[%s957_s1 + $0x44] ss:$8 sps:$4 sm:$0xff]  }
   0x6   :  { %v642_v13 = vld [vmem:[%s957_s1 + $0x134] ss:$8 sps:$4 sm:$0xff]   ;;  %v645_v15 = vld [vmem:[%s957_s1 + $0x130] ss:$8 sps:$4 sm:$0xff]   ;;  %v648_v17 = vld [vmem:[%s957_s1 + $0x144] ss:$8 sps:$4 sm:$0xff]  }
   0x7   :  { %437 = vmatpush1.bf16.msra.mxu1 %v632_v6  ;;  %v650_v18 = vld [vmem:[%s957_s1 + $0x40] ss:$8 sps:$4 sm:$0xff]   ;;  %v652_v20 = vld [vmem:[%s957_s1 + $0x54] ss:$8 sps:$4 sm:$0xff]   ;;  %v656_v22 = vld [vmem:[%s957_s1 + $0x50] ss:$8 sps:$4 sm:$0xff]  }
   0x8   :  { %480 = vmatpush1.bf16.msra.mxu0 %v633_v7  ;;  %438 = vmatprep.subr.bf16.mxu1 %v634_v8  ;;  %v651_v19 = vld [vmem:[%s957_s1 + $0x140] ss:$8 sps:$4 sm:$0xff]   ;;  %v654_v21 = vld [vmem:[%s957_s1 + $0x154] ss:$8 sps:$4 sm:$0xff]   ;;  %v657_v23 = vld [vmem:[%s957_s1 + $0x150] ss:$8 sps:$4 sm:$0xff]  }
   0x9   :  { %481 = vmatprep.subr.bf16.mxu0 %v636_v9  ;;  %v658_v24 = vld [vmem:[%s957_s1 + $0x64] ss:$8 sps:$4 sm:$0xff]   ;;  %v662_v26 = vld [vmem:[%s957_s1 + $0x60] ss:$8 sps:$4 sm:$0xff]   ;;  %v664_v28 = vld [vmem:[%s957_s1 + $0x74] ss:$8 sps:$4 sm:$0xff]  }
   0xa   :  { %v660_v25 = vld [vmem:[%s957_s1 + $0x164] ss:$8 sps:$4 sm:$0xff]   ;;  %v663_v27 = vld [vmem:[%s957_s1 + $0x160] ss:$8 sps:$4 sm:$0xff]   ;;  %v666_v29 = vld [vmem:[%s957_s1 + $0x174] ss:$8 sps:$4 sm:$0xff]  }
   0xb   :  { %439 = vmatpush1.bf16.msra.mxu1 %v638_v10  ;;  %v668_v30 = vld [vmem:[%s957_s1 + $0x70] ss:$8 sps:$4 sm:$0xff]   ;;  %v670_v32 = vld [vmem:[%s957_s1 + $0x84] ss:$8 sps:$4 sm:$0xff]   ;;  %v674_v34 = vld [vmem:[%s957_s1 + $0x80] ss:$8 sps:$4 sm:$0xff]  }
   0xc   :  { %482 = vmatpush1.bf16.msra.mxu0 %v639_v11  ;;  %440 = vmatprep.subr.bf16.mxu1 %v640_v12  ;;  %v669_v31 = vld [vmem:[%s957_s1 + $0x170] ss:$8 sps:$4 sm:$0xff]   ;;  %v672_v33 = vld [vmem:[%s957_s1 + $0x184] ss:$8 sps:$4 sm:$0xff]   ;;  %v675_v35 = vld [vmem:[%s957_s1 + $0x180] ss:$8 sps:$4 sm:$0xff]  }
   0xd   :  { %483 = vmatprep.subr.bf16.mxu0 %v642_v13  ;;  %v676_v36 = vld [vmem:[%s957_s1 + $0x94] ss:$8 sps:$4 sm:$0xff]   ;;  %v680_v38 = vld [vmem:[%s957_s1 + $0x90] ss:$8 sps:$4 sm:$0xff]   ;;  %v682_v40 = vld [vmem:[%s957_s1 + $0xa4] ss:$8 sps:$4 sm:$0xff]  }
   0xe   :  { %v678_v37 = vld [vmem:[%s957_s1 + $0x194] ss:$8 sps:$4 sm:$0xff]   ;;  %v681_v39 = vld [vmem:[%s957_s1 + $0x190] ss:$8 sps:$4 sm:$0xff]   ;;  %v684_v41 = vld [vmem:[%s957_s1 + $0x1a4] ss:$8 sps:$4 sm:$0xff]  }
   0xf   :  { %441 = vmatpush1.bf16.msra.mxu1 %v644_v14  ;;  %v686_v42 = vld [vmem:[%s957_s1 + $0xa0] ss:$8 sps:$4 sm:$0xff]   ;;  %v688_v44 = vld [vmem:[%s957_s1 + $0xb4] ss:$8 sps:$4 sm:$0xff]   ;;  %v692_v46 = vld [vmem:[%s957_s1 + $0xb0] ss:$8 sps:$4 sm:$0xff]  }
  0x10   :  { %484 = vmatpush1.bf16.msra.mxu0 %v645_v15  ;;  %442 = vmatprep.subr.bf16.mxu1 %v646_v16  ;;  %v687_v43 = vld [vmem:[%s957_s1 + $0x1a0] ss:$8 sps:$4 sm:$0xff]   ;;  %v690_v45 = vld [vmem:[%s957_s1 + $0x1b4] ss:$8 sps:$4 sm:$0xff]   ;;  %v693_v48 = vld [vmem:[%s957_s1 + $0x1b0] ss:$8 sps:$4 sm:$0xff]  }
  0x11   :  { %485 = vmatprep.subr.bf16.mxu0 %v648_v17  ;;  %v720_v47 = vld [vmem:[%s958_s0 + $0x4] ss:$16 sps:$4 sm:$0xff]   ;;  %v723_v51 = vld [vmem:[%s958_s0 + $0xc] ss:$16 sps:$4 sm:$0xff]   ;;  %v698_v52 = vld [vmem:[%s957_s1 + $0xc0] ss:$8 sps:$4 sm:$0xff]  }
  0x12   :  { %v694_v49 = vld [vmem:[%s957_s1 + $0xc4] ss:$8 sps:$4 sm:$0xff]   ;;  %466 = vmatprep.mubr.bf16.mxu1 %v720_v47  ;;  %509 = vmatprep.mubr.bf16.mxu0 %v723_v51  ;;  %v699_v53 = vld [vmem:[%s957_s1 + $0x1c0] ss:$8 sps:$4 sm:$0xff]   ;;  %v700_v54 = vld [vmem:[%s957_s1 + $0xd4] ss:$8 sps:$4 sm:$0xff]  }
  0x13   :  { %443 = vmatpush1.bf16.msra.mxu1 %v650_v18  ;;  %v696_v50 = vld [vmem:[%s957_s1 + $0x1c4] ss:$8 sps:$4 sm:$0xff]   ;;  %v702_v55 = vld [vmem:[%s957_s1 + $0x1d4] ss:$8 sps:$4 sm:$0xff]   ;;  %v704_v56 = vld [vmem:[%s957_s1 + $0xd0] ss:$8 sps:$4 sm:$0xff]  }
  0x14   :  { %486 = vmatpush1.bf16.msra.mxu0 %v651_v19  ;;  %444 = vmatprep.subr.bf16.mxu1 %v652_v20  ;;  %v705_v57 = vld [vmem:[%s957_s1 + $0x1d0] ss:$8 sps:$4 sm:$0xff]   ;;  %v706_v58 = vld [vmem:[%s957_s1 + $0xe4] ss:$8 sps:$4 sm:$0xff]   ;;  %v710_v60 = vld [vmem:[%s957_s1 + $0xe0] ss:$8 sps:$4 sm:$0xff]  }
  0x15   :  { %487 = vmatprep.subr.bf16.mxu0 %v654_v21  ;;  %v708_v59 = vld [vmem:[%s957_s1 + $0x1e4] ss:$8 sps:$4 sm:$0xff]   ;;  %v711_v61 = vld [vmem:[%s957_s1 + $0x1e0] ss:$8 sps:$4 sm:$0xff]   ;;  %v712_v62 = vld [vmem:[%s957_s1 + $0xf4] ss:$8 sps:$4 sm:$0xff]  }
  0x16   :  { %v714_v63 = vld [vmem:[%s957_s1 + $0x1f4] ss:$8 sps:$4 sm:$0xff]   ;;  %v716_v0 = vld [vmem:[%s957_s1 + $0xf0] ss:$8 sps:$4 sm:$0xff]   ;;  %v85_v5 = vshrl.u32 %v84_v4, 7 }
  0x17   :  { %445 = vmatpush1.bf16.msra.mxu1 %v656_v22  ;;  %v717_v1 = vld [vmem:[%s957_s1 + $0x1f0] ss:$8 sps:$4 sm:$0xff]   ;;  %v82_v7 = vld [vmem:[%s959_s2] sm:$0x3] }
  0x18   :  { %488 = vmatpush1.bf16.msra.mxu0 %v657_v23  ;;  %446 = vmatprep.subr.bf16.mxu1 %v658_v24  ;;  %v718_v2 = vld [vmem:[%s958_s0] ss:$16 sps:$4 sm:$0xff]   ;;  %v721_v3 = vld [vmem:[%s958_s0 + $0x8] ss:$16 sps:$4 sm:$0xff]   ;;  %v86_v6 = vsub.s32 0, %v85_v5  ;;  %v90_v8 = vsub.s32 1, %v85_v5 }
  0x19   :  { %489 = vmatprep.subr.bf16.mxu0 %v660_v25 }
  0x1a   :  { %v87_v9 = vrot.slane %v82_v7, %v86_v6  ;;  %v91_v10 = vrot.slane %v82_v7, %v90_v8 }
  0x1b   :  { %447 = vmatpush1.bf16.msra.mxu1 %v662_v26 }
  0x1c   :  { %490 = vmatpush1.bf16.msra.mxu0 %v663_v27  ;;  %448 = vmatprep.subr.bf16.mxu1 %v664_v28 }
  0x1d   :  { %491 = vmatprep.subr.bf16.mxu0 %v666_v29 }
  0x1f   :  { %449 = vmatpush1.bf16.msra.mxu1 %v668_v30 }
  0x20   :  { %492 = vmatpush1.bf16.msra.mxu0 %v669_v31  ;;  %450 = vmatprep.subr.bf16.mxu1 %v670_v32 }
  0x21   :  { %493 = vmatprep.subr.bf16.mxu0 %v672_v33 }
  0x23   :  { %451 = vmatpush1.bf16.msra.mxu1 %v674_v34 }
  0x24   :  { %494 = vmatpush1.bf16.msra.mxu0 %v675_v35  ;;  %452 = vmatprep.subr.bf16.mxu1 %v676_v36 }
  0x25   :  { %495 = vmatprep.subr.bf16.mxu0 %v678_v37 }
  0x27   :  { %453 = vmatpush1.bf16.msra.mxu1 %v680_v38 }
  0x28   :  { %496 = vmatpush1.bf16.msra.mxu0 %v681_v39  ;;  %454 = vmatprep.subr.bf16.mxu1 %v682_v40 }
  0x29   :  { %497 = vmatprep.subr.bf16.mxu0 %v684_v41 }
  0x2b   :  { %455 = vmatpush1.bf16.msra.mxu1 %v686_v42 }
  0x2c   :  { %498 = vmatpush1.bf16.msra.mxu0 %v687_v43  ;;  %456 = vmatprep.subr.bf16.mxu1 %v688_v44 }
  0x2d   :  { %499 = vmatprep.subr.bf16.mxu0 %v690_v45 }
  0x2f   :  { %457 = vmatpush1.bf16.msra.mxu1 %v692_v46 }
  0x30   :  { %500 = vmatpush1.bf16.msra.mxu0 %v693_v48  ;;  %458 = vmatprep.subr.bf16.mxu1 %v694_v49 }
  0x31   :  { %501 = vmatprep.subr.bf16.mxu0 %v696_v50 }
  0x33   :  { %459 = vmatpush1.bf16.msra.mxu1 %v698_v52 }
  0x34   :  { %502 = vmatpush1.bf16.msra.mxu0 %v699_v53  ;;  %460 = vmatprep.subr.bf16.mxu1 %v700_v54 }
  0x35   :  { %503 = vmatprep.subr.bf16.mxu0 %v702_v55 }
  0x37   :  { %461 = vmatpush1.bf16.msra.mxu1 %v704_v56 }
  0x38   :  { %504 = vmatpush1.bf16.msra.mxu0 %v705_v57  ;;  %462 = vmatprep.subr.bf16.mxu1 %v706_v58 }
  0x39   :  { %505 = vmatprep.subr.bf16.mxu0 %v708_v59 }
  0x3b   :  { %463 = vmatpush1.bf16.msra.mxu1 %v710_v60 }
  0x3c   :  { %506 = vmatpush1.bf16.msra.mxu0 %v711_v61  ;;  %464 = vmatprep.subr.bf16.mxu1 %v712_v62 }
  0x3d   :  { %507 = vmatprep.subr.bf16.mxu0 %v714_v63 }
  0x3f   :  { %465 = vmatpush1.bf16.msra.mxu1 %v716_v0 }
  0x40   :  { %508 = vmatpush1.bf16.msra.mxu0 %v717_v1 }
  0x42   :  { %467 = vmatmul.mubr.bf16.vlgmr.msra.gmra.mrb[0].mxu1 %v718_v2 }
  0x43   :  { %510 = vmatmul.mubr.bf16.vlgmr.msra.gmra.mrb[0].mxu0 %v721_v3 }
 0x115   :  { %v468_v11 = vpop.f32.mrb[0].mxu1 }
 0x116   :  { %v511_v12 = vpop.f32.mrb[0].mxu0  ;;  %v469_v13 = vadd.f32 %v468_v11, %v87_v9  ;;  %v470_v14 = vpop.f32.mrb[1].mxu1 }
 0x117   :  { %v513_v15 = vpop.f32.mrb[1].mxu0  ;;  %v471_v16 = vadd.f32 %v470_v14, %v91_v10  ;;  %v472_v17 = vpop.f32.mrb[2].mxu1 }
 0x118   :  { %v515_v18 = vpop.f32.mrb[2].mxu0  ;;  %v512_v19 = vadd.f32 %v511_v12, %v469_v13  ;;  %v473_v20 = vadd.f32 %v472_v17, %v87_v9  ;;  %v474_v21 = vpop.f32.mrb[3].mxu1 }
 0x119   :  { %v517_v22 = vpop.f32.mrb[3].mxu0  ;;  %v514_v23 = vadd.f32 %v513_v15, %v471_v16  ;;  %v475_v24 = vadd.f32 %v474_v21, %v91_v10 }
 0x11a   :  { %v520_v25 = vmax.f32 %v512_v19, 0.0  ;;  %v516_v26 = vadd.f32 %v515_v18, %v473_v20 }
 0x11b   :  { %v521_v27 = vmax.f32 %v514_v23, 0.0  ;;  %v518_v28 = vadd.f32 %v517_v22, %v475_v24 }
 0x11c   :  { %v522_v29 = vmax.f32 %v516_v26, 0.0 }
 0x11d   :  { %v612_v30 = vpack.c.bf16 %v521_v27, %v520_v25  ;;  %v523_v31 = vmax.f32 %v518_v28, 0.0 }
 0x11f   :  { %536 = vst [vmem:[%s960_s3] sm:$0xff] %v612_v30  ;;  %v613_v32 = vpack.c.bf16 %v523_v31, %v522_v29 }
 0x121   :  { %537 = vst [vmem:[%s960_s3 + $0x8] sm:$0xff] %v613_v32 }

// kernel: autoencoder_forward.10
= control target key start
LH: loop header
LB: loop body
LE: loop exit
PB: predicated region body
PF: predicated region fallthrough
CT: control target
= control target key end

     0   :  { %s446_s1 = inlined_call_operand.vmem [shape: bf16[256,128], index: 1, kind: input, shape index: {}]   ;;  %s447_s0 = inlined_call_operand.vmem [shape: bf16[32,256], index: 0, kind: input, shape index: {}]   ;;  %s448_s2 = inlined_call_operand.vmem [shape: f32[1,128], index: 2, kind: input, shape index: {}]   ;;  %s449_s3 = inlined_call_operand.vmem [shape: bf16[32,128], index: 3, kind: output, shape index: {}]  }
   0x1   :  { %v335_v0 = vld [vmem:[%s446_s1 + $0x40] sm:$0xff]   ;;  %v337_v2 = vld [vmem:[%s446_s1 + $0x48] sm:$0xff]   ;;  %v339_v4 = vld [vmem:[%s446_s1 + $0x50] sm:$0xff]  }
   0x2   :  { %v336_v1 = vld [vmem:[%s446_s1] sm:$0xff]   ;;  %291 = vmatprep.subr.bf16.mxu0 %v335_v0  ;;  %319 = vmatprep.subr.bf16.mxu1 %v335_v0  ;;  %v338_v3 = vld [vmem:[%s446_s1 + $0x8] sm:$0xff]   ;;  %v340_v5 = vld [vmem:[%s446_s1 + $0x10] sm:$0xff]  }
   0x3   :  { %292 = vmatpush3.bf16.msra.mxu0 %v336_v1  ;;  %327 = vmatpush3.bf16.msra.mxu1 %v336_v1  ;;  %v341_v6 = vld [vmem:[%s446_s1 + $0x58] sm:$0xff]   ;;  %v343_v8 = vld [vmem:[%s446_s1 + $0x60] sm:$0xff]   ;;  %v345_v10 = vld [vmem:[%s446_s1 + $0x68] sm:$0xff]  }
   0x4   :  { %293 = vmatprep.subr.bf16.mxu0 %v337_v2  ;;  %320 = vmatprep.subr.bf16.mxu1 %v337_v2  ;;  %v342_v7 = vld [vmem:[%s446_s1 + $0x18] sm:$0xff]   ;;  %v344_v9 = vld [vmem:[%s446_s1 + $0x20] sm:$0xff]   ;;  %v346_v13 = vld [vmem:[%s446_s1 + $0x28] sm:$0xff]  }
   0x5   :  { %v353_v11 = vld [vmem:[%s447_s0 + $0x4] ss:$8 sps:$4 sm:$0xff]   ;;  %v356_v12 = vld [vmem:[%s447_s0 + $0x14] ss:$8 sps:$4 sm:$0xff]   ;;  %v351_v18 = vld [vmem:[%s447_s0] ss:$8 sps:$4 sm:$0xff]  }
   0x6   :  { %v347_v14 = vld [vmem:[%s446_s1 + $0x70] sm:$0xff]   ;;  %206 = vmatprep.mubr.bf16.mxu0 %v353_v11  ;;  %214 = vmatprep.mubr.bf16.mxu1 %v356_v12  ;;  %v349_v16 = vld [vmem:[%s446_s1 + $0x78] sm:$0xff]   ;;  %v251_v22 = vld [vmem:[%s448_s2] ss:$0 sm:$0xff] }
   0x7   :  { %294 = vmatpush3.bf16.msra.mxu0 %v338_v3  ;;  %328 = vmatpush3.bf16.msra.mxu1 %v338_v3  ;;  %v348_v15 = vld [vmem:[%s446_s1 + $0x30] sm:$0xff]   ;;  %v350_v17 = vld [vmem:[%s446_s1 + $0x38] sm:$0xff]  }
   0x8   :  { %295 = vmatprep.subr.bf16.mxu0 %v339_v4  ;;  %321 = vmatprep.subr.bf16.mxu1 %v339_v4  ;;  %v354_v19 = vld [vmem:[%s447_s0 + $0x10] ss:$8 sps:$4 sm:$0xff]  }
   0xb   :  { %296 = vmatpush3.bf16.msra.mxu0 %v340_v5  ;;  %329 = vmatpush3.bf16.msra.mxu1 %v340_v5 }
   0xc   :  { %297 = vmatprep.subr.bf16.mxu0 %v341_v6  ;;  %322 = vmatprep.subr.bf16.mxu1 %v341_v6 }
   0xf   :  { %298 = vmatpush3.bf16.msra.mxu0 %v342_v7  ;;  %330 = vmatpush3.bf16.msra.mxu1 %v342_v7 }
  0x10   :  { %299 = vmatprep.subr.bf16.mxu0 %v343_v8  ;;  %323 = vmatprep.subr.bf16.mxu1 %v343_v8 }
  0x13   :  { %300 = vmatpush3.bf16.msra.mxu0 %v344_v9  ;;  %331 = vmatpush3.bf16.msra.mxu1 %v344_v9 }
  0x14   :  { %301 = vmatprep.subr.bf16.mxu0 %v345_v10  ;;  %324 = vmatprep.subr.bf16.mxu1 %v345_v10 }
  0x17   :  { %302 = vmatpush3.bf16.msra.mxu0 %v346_v13  ;;  %332 = vmatpush3.bf16.msra.mxu1 %v346_v13 }
  0x18   :  { %303 = vmatprep.subr.bf16.mxu0 %v347_v14  ;;  %325 = vmatprep.subr.bf16.mxu1 %v347_v14 }
  0x1b   :  { %304 = vmatpush3.bf16.msra.mxu0 %v348_v15  ;;  %333 = vmatpush3.bf16.msra.mxu1 %v348_v15 }
  0x1c   :  { %305 = vmatprep.subr.bf16.mxu0 %v349_v16  ;;  %326 = vmatprep.subr.bf16.mxu1 %v349_v16 }
  0x1f   :  { %306 = vmatpush3.bf16.msra.mxu0 %v350_v17  ;;  %334 = vmatpush3.bf16.msra.mxu1 %v350_v17 }
  0x22   :  { %207 = vmatmul.mubr.bf16.vlgmr.msra.gmra.mrb[0].mxu0 %v351_v18  ;;  %215 = vmatmul.mubr.bf16.vlgmr.msra.gmra.mrb[0].mxu1 %v354_v19 }
  0xf5   :  { %v307_v20 = vpop.f32.mrb[0].mxu0  ;;  %v313_v21 = vpop.f32.mrb[0].mxu1 }
  0xf6   :  { %v308_v23 = vpop.f32.mrb[1].mxu0  ;;  %v314_v24 = vpop.f32.mrb[1].mxu1 }
  0xf7   :  { %v309_v25 = vadd.f32 %v308_v23, %v307_v20  ;;  %v315_v26 = vadd.f32 %v314_v24, %v313_v21  ;;  %v310_v27 = vpop.f32.mrb[2].mxu0  ;;  %v316_v28 = vpop.f32.mrb[2].mxu1 }
  0xf8   :  { %v311_v29 = vpop.f32.mrb[3].mxu0  ;;  %v317_v30 = vpop.f32.mrb[3].mxu1 }
  0xf9   :  { %v209_v31 = vadd.f32 %v309_v25, %v251_v22  ;;  %v217_v32 = vadd.f32 %v315_v26, %v251_v22  ;;  %v312_v33 = vadd.f32 %v311_v29, %v310_v27  ;;  %v318_v34 = vadd.f32 %v317_v30, %v316_v28 }
  0xfb   :  { %v212_v35 = vadd.f32 %v312_v33, %v251_v22  ;;  %v220_v36 = vadd.f32 %v318_v34, %v251_v22  ;;  %v223_v37 = vmax.f32 %v209_v31, 0.0  ;;  %v225_v38 = vmax.f32 %v217_v32, 0.0 }
  0xfd   :  { %v224_v39 = vmax.f32 %v212_v35, 0.0  ;;  %v226_v40 = vmax.f32 %v220_v36, 0.0 }
  0xff   :  { %v283_v41 = vpack.c.bf16 %v224_v39, %v223_v37  ;;  %v288_v42 = vpack.c.bf16 %v226_v40, %v225_v38 }
 0x101   :  { %284 = vst [vmem:[%s449_s3] sm:$0xff] %v283_v41   ;;  %290 = vst [vmem:[%s449_s3 + $0x8] sm:$0xff] %v288_v42  }

// kernel: autoencoder_forward.11
= control target key start
LH: loop header
LB: loop body
LE: loop exit
PB: predicated region body
PF: predicated region fallthrough
CT: control target
= control target key end

     0   :  { %vm327_vm0 = vcmask 31744   ;;  %s662_s1 = inlined_call_operand.vmem [shape: bf16[128,4], index: 1, kind: input, shape index: {}]   ;;  %s663_s0 = inlined_call_operand.vmem [shape: bf16[128,128], index: 0, kind: input, shape index: {}]   ;;  %s664_s2 = inlined_call_operand.vmem [shape: f32[1,4], index: 2, kind: input, shape index: {}]   ;;  %s665_s3 = inlined_call_operand.vmem [shape: f32[128,4], index: 3, kind: output, shape index: {}]  }
   0x1   :  { %v429_v0 = vld [vmem:[%s662_s1] sm:$0xff]   ;;  %v430_v1 = vld [vmem:[%s662_s1 + $0x8] sm:$0xff]   ;;  %v431_v2 = vld [vmem:[%s662_s1 + $0x10] sm:$0xff]  }
   0x2   :  { %381 = vmatprep.subr.bf16.mxu0 %v429_v0  ;;  %413 = vmatprep.subr.bf16.mxu1 %v429_v0  ;;  %v432_v3 = vld [vmem:[%s662_s1 + $0x18] sm:$0xff]   ;;  %v437_v4 = vld [vmem:[%s663_s0] sm:$0xff]   ;;  %v434_v7 = vld [vmem:[%s662_s1 + $0x28] sm:$0xff]  }
   0x3   :  { %382 = vmatpush3.bf16.msra.mxu0 %v429_v0  ;;  %421 = vmatpush3.bf16.msra.mxu1 %v429_v0  ;;  %v438_v5 = vld [vmem:[%s663_s0 + $0x20] sm:$0xff]   ;;  %v435_v8 = vld [vmem:[%s662_s1 + $0x30] sm:$0xff]   ;;  %v436_v9 = vld [vmem:[%s662_s1 + $0x38] sm:$0xff]  }
   0x4   :  { %383 = vmatprep.subr.bf16.mxu0 %v430_v1  ;;  %414 = vmatprep.subr.bf16.mxu1 %v430_v1  ;;  %v433_v6 = vld [vmem:[%s662_s1 + $0x20] sm:$0xff]   ;;  %v439_v10 = vld [vmem:[%s663_s0 + $0x8] sm:$0xff]   ;;  %v441_v12 = vld [vmem:[%s663_s0 + $0x10] sm:$0xff]  }
   0x5   :  { %397 = vmatprep.mubr.bf16.mxu0 %v437_v4  ;;  %405 = vmatprep.mubr.bf16.mxu1 %v438_v5  ;;  %v440_v11 = vld [vmem:[%s663_s0 + $0x28] sm:$0xff]   ;;  %v442_v13 = vld [vmem:[%s663_s0 + $0x30] sm:$0xff]   ;;  %v443_v14 = vld [vmem:[%s663_s0 + $0x18] sm:$0xff]  }
   0x6   :  { %v444_v15 = vld [vmem:[%s663_s0 + $0x38] sm:$0xff]   ;;  %v580_v16 = vld [vmem:[%s664_s2] ss:$0 sm:$0xff] }
   0x7   :  { %384 = vmatpush3.bf16.msra.mxu0 %v430_v1  ;;  %422 = vmatpush3.bf16.msra.mxu1 %v430_v1 }
   0x8   :  { %385 = vmatprep.subr.bf16.mxu0 %v431_v2  ;;  %415 = vmatprep.subr.bf16.mxu1 %v431_v2 }
   0xb   :  { %386 = vmatpush3.bf16.msra.mxu0 %v431_v2  ;;  %423 = vmatpush3.bf16.msra.mxu1 %v431_v2 }
   0xc   :  { %387 = vmatprep.subr.bf16.mxu0 %v432_v3  ;;  %416 = vmatprep.subr.bf16.mxu1 %v432_v3 }
   0xf   :  { %388 = vmatpush3.bf16.msra.mxu0 %v432_v3  ;;  %424 = vmatpush3.bf16.msra.mxu1 %v432_v3 }
  0x10   :  { %389 = vmatprep.subr.bf16.mxu0 %v433_v6  ;;  %417 = vmatprep.subr.bf16.mxu1 %v433_v6 }
  0x13   :  { %390 = vmatpush3.bf16.msra.mxu0 %v433_v6  ;;  %425 = vmatpush3.bf16.msra.mxu1 %v433_v6 }
  0x14   :  { %391 = vmatprep.subr.bf16.mxu0 %v434_v7  ;;  %418 = vmatprep.subr.bf16.mxu1 %v434_v7 }
  0x17   :  { %392 = vmatpush3.bf16.msra.mxu0 %v434_v7  ;;  %426 = vmatpush3.bf16.msra.mxu1 %v434_v7 }
  0x18   :  { %393 = vmatprep.subr.bf16.mxu0 %v435_v8  ;;  %419 = vmatprep.subr.bf16.mxu1 %v435_v8 }
  0x1b   :  { %394 = vmatpush3.bf16.msra.mxu0 %v435_v8  ;;  %427 = vmatpush3.bf16.msra.mxu1 %v435_v8 }
  0x1c   :  { %395 = vmatprep.subr.bf16.mxu0 %v436_v9  ;;  %420 = vmatprep.subr.bf16.mxu1 %v436_v9 }
  0x1f   :  { %396 = vmatpush3.bf16.msra.mxu0 %v436_v9  ;;  %428 = vmatpush3.bf16.msra.mxu1 %v436_v9 }
  0x22   :  { %398 = vmatmul.mubr.bf16.vlgmr.msra.gmra.mrb[0].mxu0 %v439_v10  ;;  %406 = vmatmul.mubr.bf16.vlgmr.msra.gmra.mrb[0].mxu1 %v440_v11 }
  0x23   :  { %401 = vmatprep.mubr.bf16.mxu0 %v441_v12  ;;  %409 = vmatprep.mubr.bf16.mxu1 %v442_v13 }
  0x2a   :  { %402 = vmatmul.mubr.bf16.gmra.mrb[4].mxu0 %v443_v14  ;;  %410 = vmatmul.mubr.bf16.gmra.mrb[4].mxu1 %v444_v15 }
  0xf5   :  { %v399_v17 = vpop.f32.mrb[0].mxu0  ;;  %v407_v18 = vpop.f32.mrb[0].mxu1 }
  0xf6   :  { %v193_v19 = vadd.f32 %v399_v17, %v580_v16  ;;  %v225_v20 = vadd.f32 %v407_v18, %v580_v16  ;;  %v184_v21 = vpop.f32.mrb[1].mxu0  ;;  %v216_v22 = vpop.f32.mrb[1].mxu1 }
  0xf7   :  { %v185_v23 = vadd.f32 %v580_v16, %v184_v21  ;;  %v217_v24 = vadd.f32 %v580_v16, %v216_v22  ;;  %v400_v25 = vpop.f32.mrb[2].mxu0  ;;  %v408_v26 = vpop.f32.mrb[2].mxu1 }
  0xf8   :  { %v249_v27 = vsub.f32 0.0, %v193_v19  ;;  %v257_v28 = vsub.f32 0.0, %v225_v20  ;;  %v196_v29 = vadd.f32 %v400_v25, %v580_v16  ;;  %v228_v30 = vadd.f32 %v408_v26, %v580_v16  ;;  %v187_v31 = vpop.f32.mrb[3].mxu0  ;;  %v219_v32 = vpop.f32.mrb[3].mxu1 }
  0xf9   :  { %v247_v33 = vsub.f32 0.0, %v185_v23  ;;  %v255_v34 = vsub.f32 0.0, %v217_v24  ;;  %v188_v35 = vadd.f32 %v580_v16, %v187_v31  ;;  %v220_v36 = vadd.f32 %v580_v16, %v219_v32 }
  0xfa   :  { %v267_v37 = vmul.f32 1.442695, %v249_v27  ;;  %v283_v38 = vmul.f32 1.442695, %v257_v28  ;;  %v250_v39 = vsub.f32 0.0, %v196_v29  ;;  %v258_v40 = vsub.f32 0.0, %v228_v30 }
  0xfb   :  { %v263_v41 = vmul.f32 1.442695, %v247_v33  ;;  %v279_v42 = vmul.f32 1.442695, %v255_v34  ;;  %v248_v43 = vsub.f32 0.0, %v188_v35  ;;  %v256_v44 = vsub.f32 0.0, %v220_v36 }
  0xfc   :  { %445 = vpow2.f32 %v267_v37  ;;  %v269_v45 = vmul.f32 1.442695, %v250_v39  ;;  %v285_v46 = vmul.f32 1.442695, %v258_v40 }
  0xfd   :  { %447 = vpow2.f32 %v283_v38  ;;  %v403_v47 = vpop.f32.mrb[4].mxu0  ;;  %v411_v48 = vpop.f32.mrb[4].mxu1  ;;  %v265_v49 = vmul.f32 1.442695, %v248_v43  ;;  %v281_v54 = vmul.f32 1.442695, %v256_v44 }
  0xfe   :  { %449 = vpow2.f32 %v263_v41  ;;  %v209_v50 = vadd.f32 %v403_v47, %v580_v16  ;;  %v241_v51 = vadd.f32 %v411_v48, %v580_v16  ;;  %v200_v52 = vpop.f32.mrb[5].mxu0  ;;  %v232_v53 = vpop.f32.mrb[5].mxu1 }
  0xff   :  { %451 = vpow2.f32 %v279_v42  ;;  %v201_v55 = vadd.f32 %v580_v16, %v200_v52  ;;  %v233_v56 = vadd.f32 %v580_v16, %v232_v53  ;;  %v404_v57 = vpop.f32.mrb[6].mxu0  ;;  %v412_v58 = vpop.f32.mrb[6].mxu1 }
 0x100   :  { %453 = vpow2.f32 %v269_v45  ;;  %v253_v59 = vsub.f32 0.0, %v209_v50  ;;  %v261_v60 = vsub.f32 0.0, %v241_v51  ;;  %v212_v61 = vadd.f32 %v404_v57, %v580_v16  ;;  %v203_v62 = vpop.f32.mrb[7].mxu0  ;;  %v235_v63 = vpop.f32.mrb[7].mxu1 }
 0x101   :  { %455 = vpow2.f32 %v285_v46  ;;  %v251_v0 = vsub.f32 0.0, %v201_v55  ;;  %v259_v1 = vsub.f32 0.0, %v233_v56  ;;  %v244_v18 = vadd.f32 %v412_v58, %v580_v16 }
 0x102   :  { %457 = vpow2.f32 %v265_v49  ;;  %v275_v2 = vmul.f32 1.442695, %v253_v59  ;;  %v291_v3 = vmul.f32 1.442695, %v261_v60  ;;  %v254_v4 = vsub.f32 0.0, %v212_v61 }
 0x103   :  { %459 = vpow2.f32 %v281_v54  ;;  %v271_v5 = vmul.f32 1.442695, %v251_v0  ;;  %v287_v6 = vmul.f32 1.442695, %v259_v1  ;;  %v204_v21 = vadd.f32 %v580_v16, %v203_v62 }
 0x104   :  { %461 = vpow2.f32 %v275_v2  ;;  %v277_v7 = vmul.f32 1.442695, %v254_v4  ;;  %v236_v24 = vadd.f32 %v580_v16, %v235_v63  ;;  %v262_v29 = vsub.f32 0.0, %v244_v18 }
 0x105   :  { %463 = vpow2.f32 %v291_v3  ;;  %v252_v32 = vsub.f32 0.0, %v204_v21 }
 0x106   :  { %v446_v8 = vpop.eup %445  ;;  %465 = vpow2.f32 %v271_v5  ;;  %v260_v35 = vsub.f32 0.0, %v236_v24  ;;  %v293_v39 = vmul.f32 1.442695, %v262_v29 }
 0x107   :  { %v448_v9 = vpop.eup %447  ;;  %v297_v10 = vadd.f32 1.0, %v446_v8  ;;  %467 = vpow2.f32 %v287_v6  ;;  %v273_v42 = vmul.f32 1.442695, %v252_v32 }
 0x108   :  { %v450_v11 = vpop.eup %449  ;;  %v305_v12 = vadd.f32 1.0, %v448_v9  ;;  %469 = vpow2.f32 %v277_v7  ;;  %v289_v44 = vmul.f32 1.442695, %v260_v35 }
 0x109   :  { %v452_v13 = vpop.eup %451  ;;  %471 = vrcp.f32 %v297_v10  ;;  %v295_v14 = vadd.f32 1.0, %v450_v11 }
 0x10a   :  { %v454_v15 = vpop.eup %453  ;;  %473 = vrcp.f32 %v305_v12  ;;  %v303_v17 = vadd.f32 1.0, %v452_v13 }
 0x10b   :  { %v456_v19 = vpop.eup %455  ;;  %475 = vrcp.f32 %v295_v14  ;;  %v298_v20 = vadd.f32 1.0, %v454_v15 }
 0x10c   :  { %v458_v22 = vpop.eup %457  ;;  %477 = vrcp.f32 %v303_v17  ;;  %v306_v23 = vadd.f32 1.0, %v456_v19 }
 0x10d   :  { %v460_v25 = vpop.eup %459  ;;  %479 = vrcp.f32 %v298_v20  ;;  %v296_v26 = vadd.f32 1.0, %v458_v22 }
 0x10e   :  { %v462_v27 = vpop.eup %461  ;;  %481 = vrcp.f32 %v306_v23  ;;  %v304_v28 = vadd.f32 1.0, %v460_v25 }
 0x10f   :  { %v464_v30 = vpop.eup %463  ;;  %483 = vrcp.f32 %v296_v26  ;;  %v301_v31 = vadd.f32 1.0, %v462_v27 }
 0x110   :  { %v466_v33 = vpop.eup %465  ;;  %485 = vrcp.f32 %v304_v28  ;;  %v309_v34 = vadd.f32 1.0, %v464_v30 }
 0x111   :  { %v468_v36 = vpop.eup %467  ;;  %487 = vrcp.f32 %v301_v31  ;;  %v299_v37 = vadd.f32 1.0, %v466_v33 }
 0x112   :  { %v470_v16 = vpop.eup %469  ;;  %489 = vrcp.f32 %v309_v34  ;;  %v307_v38 = vadd.f32 1.0, %v468_v36 }
 0x113   :  { %v472_v40 = vpop.eup %471  ;;  %491 = vrcp.f32 %v299_v37  ;;  %v302_v41 = vadd.f32 1.0, %v470_v16 }
 0x114   :  { %v474_v43 = vpop.eup %473  ;;  %330 = vst.msk [vmem:[%s665_s3 + $0x10] sm:$0xff] %vm327_vm0, %v472_v40  ;;  %493 = vrcp.f32 %v307_v38 }
 0x115   :  { %v476_v45 = vpop.eup %475  ;;  %338 = vst.msk [vmem:[%s665_s3 + $0x50] sm:$0xff] %vm327_vm0, %v474_v43  ;;  %495 = vrcp.f32 %v302_v41 }
 0x116   :  { %v478_v46 = vpop.eup %477  ;;  %328 = vst.msk [vmem:[%s665_s3] sm:$0xff] %vm327_vm0, %v476_v45  ;;  %497 = vpow2.f32 %v293_v39 }
 0x117   :  { %v480_v47 = vpop.eup %479  ;;  %336 = vst.msk [vmem:[%s665_s3 + $0x40] sm:$0xff] %vm327_vm0, %v478_v46  ;;  %499 = vpow2.f32 %v273_v42 }
 0x118   :  { %v482_v48 = vpop.eup %481  ;;  %331 = vst.msk [vmem:[%s665_s3 + $0x18] sm:$0xff] %vm327_vm0, %v480_v47  ;;  %501 = vpow2.f32 %v289_v44 }
 0x119   :  { %v484_v49 = vpop.eup %483  ;;  %339 = vst.msk [vmem:[%s665_s3 + $0x58] sm:$0xff] %vm327_vm0, %v482_v48 }
 0x11a   :  { %v486_v50 = vpop.eup %485  ;;  %329 = vst.msk [vmem:[%s665_s3 + $0x8] sm:$0xff] %vm327_vm0, %v484_v49 }
 0x11b   :  { %v488_v51 = vpop.eup %487  ;;  %337 = vst.msk [vmem:[%s665_s3 + $0x48] sm:$0xff] %vm327_vm0, %v486_v50 }
 0x11c   :  { %v490_v52 = vpop.eup %489  ;;  %334 = vst.msk [vmem:[%s665_s3 + $0x30] sm:$0xff] %vm327_vm0, %v488_v51 }
 0x11d   :  { %v492_v53 = vpop.eup %491  ;;  %342 = vst.msk [vmem:[%s665_s3 + $0x70] sm:$0xff] %vm327_vm0, %v490_v52 }
 0x11e   :  { %v494_v54 = vpop.eup %493  ;;  %332 = vst.msk [vmem:[%s665_s3 + $0x20] sm:$0xff] %vm327_vm0, %v492_v53 }
 0x11f   :  { %v496_v55 = vpop.eup %495  ;;  %340 = vst.msk [vmem:[%s665_s3 + $0x60] sm:$0xff] %vm327_vm0, %v494_v54 }
 0x120   :  { %v498_v56 = vpop.eup %497  ;;  %335 = vst.msk [vmem:[%s665_s3 + $0x38] sm:$0xff] %vm327_vm0, %v496_v55 }
 0x121   :  { %v500_v57 = vpop.eup %499  ;;  %v310_v58 = vadd.f32 1.0, %v498_v56 }
 0x122   :  { %v502_v59 = vpop.eup %501  ;;  %v300_v60 = vadd.f32 1.0, %v500_v57 }
 0x123   :  { %503 = vrcp.f32 %v310_v58  ;;  %v308_v61 = vadd.f32 1.0, %v502_v59 }
 0x124   :  { %505 = vrcp.f32 %v300_v60 }
 0x125   :  { %507 = vrcp.f32 %v308_v61 }
 0x12d   :  { %v504_v62 = vpop.eup %503 }
 0x12e   :  { %v506_v63 = vpop.eup %505  ;;  %343 = vst.msk [vmem:[%s665_s3 + $0x78] sm:$0xff] %vm327_vm0, %v504_v62 }
 0x12f   :  { %v508_v0 = vpop.eup %507  ;;  %333 = vst.msk [vmem:[%s665_s3 + $0x28] sm:$0xff] %vm327_vm0, %v506_v63 }
 0x130   :  { %341 = vst.msk [vmem:[%s665_s3 + $0x68] sm:$0xff] %vm327_vm0, %v508_v0 }

</bundles_post_ra>
